<compile_context>
chip_gen: v5e
topology: v5e:2x2
jax: 0.10.0
libtpu: 0.0.40
codegen_flags: <defaults>
</compile_context>

<pallas_src>
import jax
import jax.numpy as jnp
import numpy as np
from jax.experimental import pallas as pl
from jax.experimental.pallas import tpu as pltpu

EPS = 1e-5
CIN_PAD = 8      # layer-1 input channels padded 3 -> 8 (aligned sublane concats)


# ------------------------------- fused kernel --------------------------------

def fused_forward_kernel(x_ref, g0_ref, g1_ref,
                         w1_ref, w2_ref, w3_ref, bconv_ref,
                         sel1_ref, sel2_ref, wfc1_ref, wfc2_ref, bfc_ref,
                         o_ref, flat_ref):
    tb = x_ref.shape[0]
    c1, c2, c3 = w1_ref.shape[0], w2_ref.shape[0], w3_ref.shape[0]
    fc = wfc1_ref.shape[1]

    # Hoist constant loads out of the per-sample loop.
    w1 = w1_ref[...]
    w2 = w2_ref[...]
    w3 = w3_ref[...]
    sel1 = sel1_ref[...]
    sel2 = sel2_ref[...]
    bconv = bconv_ref[...]
    b1 = bconv[0:c1]
    b2 = bconv[c1:c1 + c2]
    b3 = bconv[c1 + c2:c1 + c2 + c3]
    bfc = bfc_ref[...]
    bfc1 = bfc[:, 0:fc]
    bfc2 = bfc[:, fc:]

    def conv_relu_pairmax(x_in, w, bias):
        """Conv1d(valid) via im2col (one MXU dot) + bias + ReLU + pairwise max.

        Returns the (Cout, L_out-1) pair-max; column 2*j is the MaxPool(2,2)
        output j.  Even-column selection is done by the caller (host-provided
        0/1 matrix, or folded into the fc1 weight for layer 3)."""
        cin = x_in.shape[0]
        k = w.shape[1] // cin
        l_out = x_in.shape[1] - k + 1
        # Aligned sublane concat of the K lane-shifted slices -> (K*Cin, L_out).
        stack = jnp.concatenate([x_in[:, i:i + l_out] for i in range(k)], axis=0)
        acc = jnp.dot(w, stack, preferred_element_type=jnp.float32) + bias
        acc = jnp.maximum(acc, 0.0)
        return jnp.maximum(acc[:, :l_out - 1], acc[:, 1:])

    for s in range(tb):                                  # static unroll over block
        # layer 1: (CIN_PAD, 150) -> (16, 68)
        m1 = conv_relu_pairmax(x_ref[s], w1, b1)
        l1 = jnp.dot(m1, sel1, preferred_element_type=jnp.float32)
        # layer 2: cat([l1, gate0]) along channels -> (8, 30)
        x2 = jnp.concatenate([l1, g0_ref[s]], axis=0)
        m2 = conv_relu_pairmax(x2, w2, b2)
        l2 = jnp.dot(m2, sel2, preferred_element_type=jnp.float32)
        # layer 3: cat([l2, gate1]); pool + flatten are folded into wfc1.
        x3 = jnp.concatenate([l2, g1_ref[s]], axis=0)
        m3 = conv_relu_pairmax(x3, w3, b3)               # (c3, l3_out-1)
        w3cols = m3.shape[1]
        for c in range(c3):                              # 8 small masked stores
            flat_ref[s:s + 1, c * w3cols:(c + 1) * w3cols] = m3[c:c + 1, :]

    # fc1 + ReLU + fc2 over the whole batch block (M = TB), lane-dense output.
    flat = flat_ref[...]
    h = jnp.dot(flat, wfc1_ref[...], preferred_element_type=jnp.float32) + bfc1
    h = jnp.maximum(h, 0.0)
    out = jnp.dot(h, wfc2_ref[...], preferred_element_type=jnp.float32) + bfc2
    o_ref[0] = out


# --------------------------------- wrapper ------------------------------------

def _const_spec(arr):
    nd = arr.ndim
    return pl.BlockSpec(tuple(arr.shape), lambda b, _nd=nd: (0,) * _nd)


def _batch_block(batch):
    """Two even grid steps on v7x (2 TensorCores/chip); one step on v5e/v6e."""
    try:
        kind = jax.devices()[0].device_kind.lower()
    except Exception:
        kind = ""
    if ("v7" in kind or "tpu7" in kind) and batch >= 2 and batch % 2 == 0:
        return batch // 2
    return batch


def forward_pallas(params, x, gate_feature):
    g0, g1 = gate_feature
    B = x.shape[0]
    n_out = params["n_out"]
    lane_out = params["w_fc2"].shape[1]
    flat_w = params["w_fc1"].shape[0]

    tb = _batch_block(B)
    steps = B // tb
    xp = jnp.pad(x, ((0, 0), (0, CIN_PAD - x.shape[1]), (0, 0)))   # (B, 8, L)

    weight_names = ("w1", "w2", "w3", "b_conv", "sel1", "sel2",
                    "w_fc1", "w_fc2", "b_fc")
    weights = [params[k] for k in weight_names]

    in_specs = [
        pl.BlockSpec((tb,) + xp.shape[1:], lambda b: (b, 0, 0)),
        pl.BlockSpec((tb,) + g0.shape[1:], lambda b: (b, 0, 0)),
        pl.BlockSpec((tb,) + g1.shape[1:], lambda b: (b, 0, 0)),
    ] + [_const_spec(w) for w in weights]

    out = pl.pallas_call(
        fused_forward_kernel,
        out_shape=jax.ShapeDtypeStruct((steps, tb, lane_out), jnp.float32),
        grid=(steps,),
        in_specs=in_specs,
        out_specs=pl.BlockSpec((1, tb, lane_out), lambda b: (b, 0, 0)),
        scratch_shapes=[pltpu.VMEM((tb, flat_w), jnp.float32)],
        compiler_params=pltpu.CompilerParams(
            dimension_semantics=("parallel",)),
    )(xp, g0, g1, *weights)
    return out.reshape(B, lane_out)[:, :n_out]


# -------------------- deterministic parameter construction -------------------

def init_params(key, output_size=17, conv=(16, 8, 8), fc=96):
    ks = iter(jax.random.split(key, 32))

    def nrm(shape, scale=0.1):
        return scale * jax.random.normal(next(ks), shape, jnp.float32)

    def bn(c):
        gamma = 1.0 + 0.1 * jax.random.normal(next(ks), (c,), jnp.float32)
        beta = 0.1 * jax.random.normal(next(ks), (c,), jnp.float32)
        mean = 0.1 * jax.random.normal(next(ks), (c,), jnp.float32)
        var = jax.random.uniform(next(ks), (c,), jnp.float32, 0.5, 1.5)
        return gamma, beta, mean, var

    raw = {}
    raw["bn_in"] = bn(3)
    raw["conv1_w"], raw["conv1_b"] = nrm((conv[0], 3, 15)), nrm((conv[0],))
    raw["bn1"] = bn(conv[0])
    raw["conv2_w"], raw["conv2_b"] = nrm((conv[1], conv[0] * 2, 9)), nrm((conv[1],))
    raw["bn2"] = bn(conv[1])
    raw["conv3_w"], raw["conv3_b"] = nrm((conv[2], conv[1] * 2, 5)), nrm((conv[2],))
    raw["bn3"] = bn(conv[2])
    raw["fc1_w"], raw["fc1_b"] = nrm((fc, conv[2] * 13)), nrm((fc,))
    raw["fc2_w"], raw["fc2_b"] = nrm((output_size, fc)), nrm((output_size,))
    return raw


def fold_output_bn(w, b, bn):
    g, bt, m, v = bn
    s = g / jnp.sqrt(v + EPS)
    return w * s[:, None, None], (b - m) * s + bt


def fold_input_bn(w, b, bn):
    g, bt, m, v = bn
    a = g / jnp.sqrt(v + EPS)
    c = bt - m * a
    return w * a[None, :, None], b + jnp.einsum("oik,i->o", w, c)


def prepare_kernel_params(raw, l_in=150):
    w1, b1 = fold_input_bn(raw["conv1_w"], raw["conv1_b"], raw["bn_in"])
    w1, b1 = fold_output_bn(w1, b1, raw["bn1"])
    w2, b2 = fold_output_bn(raw["conv2_w"], raw["conv2_b"], raw["bn2"])
    w3, b3 = fold_output_bn(raw["conv3_w"], raw["conv3_b"], raw["bn3"])

    def im2col_w(w, cin_pad=None):
        # (Cout, Cin, K) -> (Cout, K*Cin_pad), tap-major / channel-minor.
        cout, cin, k = w.shape
        cin_pad = cin if cin_pad is None else cin_pad
        wt = jnp.transpose(w, (0, 2, 1))                      # (Cout, K, Cin)
        wt = jnp.pad(wt, ((0, 0), (0, 0), (0, cin_pad - cin)))
        return wt.reshape(cout, k * cin_pad)

    def pool_sel(l_out):
        # Selects even columns of the (L_out-1)-wide pair-max => MaxPool(2,2).
        l_p = l_out // 2
        sel = np.zeros((l_out - 1, l_p), np.float32)
        sel[2 * np.arange(l_p), np.arange(l_p)] = 1.0
        return jnp.asarray(sel)

    k1 = raw["conv1_w"].shape[2]
    k2 = raw["conv2_w"].shape[2]
    k3 = raw["conv3_w"].shape[2]
    c3 = raw["conv3_w"].shape[0]
    fc = raw["fc1_w"].shape[0]
    n_out = raw["fc2_w"].shape[0]

    l1 = l_in - k1 + 1
    p1 = l1 // 2
    l2 = p1 - k2 + 1
    p2 = l2 // 2
    l3 = p2 - k3 + 1
    p3 = l3 // 2
    assert raw["fc1_w"].shape[1] == c3 * p3

    # Fold layer-3 MaxPool(2,2) + flatten into fc1: the (c3, l3-1) pair-max rows
    # are written contiguously into a (TB, c3*(l3-1)) scratch; row c*(l3-1)+2*j
    # of wfc1_eff is fc1_w's column for flattened feature c*p3 + j, rest zero.
    wfc1 = raw["fc1_w"].T                                     # (c3*p3, fc)
    row_idx = (jnp.arange(c3)[:, None] * (l3 - 1)
               + 2 * jnp.arange(p3)[None, :]).reshape(-1)
    wfc1_eff = jnp.zeros((c3 * (l3 - 1), fc), jnp.float32).at[row_idx].set(wfc1)

    lane_out = ((n_out + 127) // 128) * 128                   # lane-dense output
    w_fc2 = jnp.zeros((fc, lane_out), jnp.float32).at[:, :n_out].set(raw["fc2_w"].T)
    b_fc2 = jnp.zeros((lane_out,), jnp.float32).at[:n_out].set(raw["fc2_b"])

    return dict(
        w1=im2col_w(w1, CIN_PAD), w2=im2col_w(w2), w3=im2col_w(w3),
        b_conv=jnp.concatenate([b1, b2, b3])[:, None],        # (32, 1)
        sel1=pool_sel(l1), sel2=pool_sel(l2),
        w_fc1=wfc1_eff, w_fc2=w_fc2,
        b_fc=jnp.concatenate([raw["fc1_b"], b_fc2])[None, :],  # (1, fc+lane_out)
        n_out=n_out,
    )


# ------------------------- pure-JAX reference ---------------------------------

_HI = jax.lax.Precision.HIGHEST


def _bn1d(x, bn):
    g, bt, m, v = bn
    s = g / jnp.sqrt(v + EPS)
    return x * s[None, :, None] + (bt - m * s)[None, :, None]


def _conv1d(x, w, b):
    y = jax.lax.conv_general_dilated(
        x, w, window_strides=(1,), padding="VALID",
        dimension_numbers=("NCH", "OIH", "NCH"), precision=_HI)
    return y + b[None, :, None]


def _maxpool2_ref(x):
    B, C, L = x.shape
    return x[:, :, :(L // 2) * 2].reshape(B, C, L // 2, 2).max(axis=-1)


def forward_reference(raw, x, gate_feature):
    g0, g1 = gate_feature
    h = _maxpool2_ref(jnp.maximum(
        _bn1d(_conv1d(_bn1d(x, raw["bn_in"]), raw["conv1_w"], raw["conv1_b"]),
              raw["bn1"]), 0.0))
    h = jnp.concatenate([h, g0], axis=1)
    h = _maxpool2_ref(jnp.maximum(
        _bn1d(_conv1d(h, raw["conv2_w"], raw["conv2_b"]), raw["bn2"]), 0.0))
    h = jnp.concatenate([h, g1], axis=1)
    h = _maxpool2_ref(jnp.maximum(
        _bn1d(_conv1d(h, raw["conv3_w"], raw["conv3_b"]), raw["bn3"]), 0.0))
    flat = h.reshape(h.shape[0], -1)
    h = jnp.maximum(jnp.dot(flat, raw["fc1_w"].T, precision=_HI) + raw["fc1_b"], 0.0)
    return jnp.dot(h, raw["fc2_w"].T, precision=_HI) + raw["fc2_b"]


# ----------------------------------- main -------------------------------------

if __name__ == "__main__":
    B, L = 2, 150   # L=150 gives conv[2]*13 = 104 flattened features, as fc1 expects
    key = jax.random.PRNGKey(0)
    k_par, k_x, k_g0, k_g1 = jax.random.split(key, 4)

    raw = init_params(k_par)
    params = prepare_kernel_params(raw, l_in=L)

    x = jax.random.normal(k_x, (B, 3, L), jnp.float32)
    gate_feature = (
        jax.random.normal(k_g0, (B, 16, 68), jnp.float32),   # cat after layer_1
        jax.random.normal(k_g1, (B, 8, 30), jnp.float32),    # cat after layer_2
    )

    out = jax.block_until_ready(forward_pallas(params, x, gate_feature))
    ref = forward_reference(raw, x, gate_feature)
    assert out.shape == (B, 17)
    np.testing.assert_allclose(np.asarray(out), np.asarray(ref),
                               rtol=1e-3, atol=1e-3)
    print("KERNEL_OK")
</pallas_src>

<mosaic_0001>
module attributes {stable_mosaic.version = 11 : i64} {
  func.func @fused_forward_kernel(%arg0: i32, %arg1: memref<2x8x150xf32, #tpu.memory_space<vmem>>, %arg2: memref<2x16x68xf32, #tpu.memory_space<vmem>>, %arg3: memref<2x8x30xf32, #tpu.memory_space<vmem>>, %arg4: memref<16x120xf32, #tpu.memory_space<vmem>>, %arg5: memref<8x288xf32, #tpu.memory_space<vmem>>, %arg6: memref<8x80xf32, #tpu.memory_space<vmem>>, %arg7: memref<32x1xf32, #tpu.memory_space<vmem>>, %arg8: memref<135x68xf32, #tpu.memory_space<vmem>>, %arg9: memref<59x30xf32, #tpu.memory_space<vmem>>, %arg10: memref<200x96xf32, #tpu.memory_space<vmem>>, %arg11: memref<96x128xf32, #tpu.memory_space<vmem>>, %arg12: memref<1x224xf32, #tpu.memory_space<vmem>>, %arg13: memref<1x2x128xf32, #tpu.memory_space<vmem>>, %arg14: memref<2x200xf32, #tpu.memory_space<vmem>>) attributes {dimension_semantics = [#tpu.dimension_semantics<parallel>], iteration_bounds = array<i64: 1>, scalar_prefetch = 0 : i64, scratch_operands = 1 : i64, tpu.core_type = #tpu.core_type<tc>, window_params = [{transform_indices = @transform_0, window_bounds = array<i64: 2, 8, 150>}, {transform_indices = @transform_1, window_bounds = array<i64: 2, 16, 68>}, {transform_indices = @transform_2, window_bounds = array<i64: 2, 8, 30>}, {pipeline_mode = #tpu.pipeline_mode<synchronous>, transform_indices = @transform_3, window_bounds = array<i64: 16, 120>}, {pipeline_mode = #tpu.pipeline_mode<synchronous>, transform_indices = @transform_4, window_bounds = array<i64: 8, 288>}, {pipeline_mode = #tpu.pipeline_mode<synchronous>, transform_indices = @transform_5, window_bounds = array<i64: 8, 80>}, {pipeline_mode = #tpu.pipeline_mode<synchronous>, transform_indices = @transform_6, window_bounds = array<i64: 32, 1>}, {pipeline_mode = #tpu.pipeline_mode<synchronous>, transform_indices = @transform_7, window_bounds = array<i64: 135, 68>}, {pipeline_mode = #tpu.pipeline_mode<synchronous>, transform_indices = @transform_8, window_bounds = array<i64: 59, 30>}, {pipeline_mode = #tpu.pipeline_mode<synchronous>, transform_indices = @transform_9, window_bounds = array<i64: 200, 96>}, {pipeline_mode = #tpu.pipeline_mode<synchronous>, transform_indices = @transform_10, window_bounds = array<i64: 96, 128>}, {pipeline_mode = #tpu.pipeline_mode<synchronous>, transform_indices = @transform_11, window_bounds = array<i64: 1, 224>}, {transform_indices = @transform_12, window_bounds = array<i64: 1, 2, 128>}]} {
    %c0 = arith.constant 0 : index
    %c0_0 = arith.constant 0 : index
    %0 = vector.load %arg4[%c0, %c0_0] : memref<16x120xf32, #tpu.memory_space<vmem>>, vector<16x120xf32>
    %c0_1 = arith.constant 0 : index
    %c0_2 = arith.constant 0 : index
    %1 = vector.load %arg5[%c0_1, %c0_2] : memref<8x288xf32, #tpu.memory_space<vmem>>, vector<8x288xf32>
    %c0_3 = arith.constant 0 : index
    %c0_4 = arith.constant 0 : index
    %2 = vector.load %arg6[%c0_3, %c0_4] : memref<8x80xf32, #tpu.memory_space<vmem>>, vector<8x80xf32>
    %c0_5 = arith.constant 0 : index
    %c0_6 = arith.constant 0 : index
    %3 = vector.load %arg8[%c0_5, %c0_6] : memref<135x68xf32, #tpu.memory_space<vmem>>, vector<135x68xf32>
    %c0_7 = arith.constant 0 : index
    %c0_8 = arith.constant 0 : index
    %4 = vector.load %arg9[%c0_7, %c0_8] : memref<59x30xf32, #tpu.memory_space<vmem>>, vector<59x30xf32>
    %c0_9 = arith.constant 0 : index
    %c0_10 = arith.constant 0 : index
    %5 = vector.load %arg7[%c0_9, %c0_10] : memref<32x1xf32, #tpu.memory_space<vmem>>, vector<32x1xf32>
    %6 = vector.extract_strided_slice %5 {offsets = [0, 0], sizes = [16, 1], strides = [1, 1]} : vector<32x1xf32> to vector<16x1xf32>
    %7 = vector.extract_strided_slice %5 {offsets = [16, 0], sizes = [8, 1], strides = [1, 1]} : vector<32x1xf32> to vector<8x1xf32>
    %8 = vector.extract_strided_slice %5 {offsets = [24, 0], sizes = [8, 1], strides = [1, 1]} : vector<32x1xf32> to vector<8x1xf32>
    %c0_11 = arith.constant 0 : index
    %c0_12 = arith.constant 0 : index
    %9 = vector.load %arg12[%c0_11, %c0_12] : memref<1x224xf32, #tpu.memory_space<vmem>>, vector<1x224xf32>
    %10 = vector.extract_strided_slice %9 {offsets = [0, 0], sizes = [1, 96], strides = [1, 1]} : vector<1x224xf32> to vector<1x96xf32>
    %11 = vector.extract_strided_slice %9 {offsets = [0, 96], sizes = [1, 128], strides = [1, 1]} : vector<1x224xf32> to vector<1x128xf32>
    %c0_13 = arith.constant 0 : index
    %c0_14 = arith.constant 0 : index
    %c0_15 = arith.constant 0 : index
    %12 = vector.load %arg1[%c0_13, %c0_14, %c0_15] : memref<2x8x150xf32, #tpu.memory_space<vmem>>, vector<1x8x150xf32>
    %13 = vector.shape_cast %12 : vector<1x8x150xf32> to vector<8x150xf32>
    %14 = vector.extract_strided_slice %13 {offsets = [0, 0], sizes = [8, 136], strides = [1, 1]} : vector<8x150xf32> to vector<8x136xf32>
    %15 = vector.extract_strided_slice %13 {offsets = [0, 1], sizes = [8, 136], strides = [1, 1]} : vector<8x150xf32> to vector<8x136xf32>
    %16 = vector.extract_strided_slice %13 {offsets = [0, 2], sizes = [8, 136], strides = [1, 1]} : vector<8x150xf32> to vector<8x136xf32>
    %17 = vector.extract_strided_slice %13 {offsets = [0, 3], sizes = [8, 136], strides = [1, 1]} : vector<8x150xf32> to vector<8x136xf32>
    %18 = vector.extract_strided_slice %13 {offsets = [0, 4], sizes = [8, 136], strides = [1, 1]} : vector<8x150xf32> to vector<8x136xf32>
    %19 = vector.extract_strided_slice %13 {offsets = [0, 5], sizes = [8, 136], strides = [1, 1]} : vector<8x150xf32> to vector<8x136xf32>
    %20 = vector.extract_strided_slice %13 {offsets = [0, 6], sizes = [8, 136], strides = [1, 1]} : vector<8x150xf32> to vector<8x136xf32>
    %21 = vector.extract_strided_slice %13 {offsets = [0, 7], sizes = [8, 136], strides = [1, 1]} : vector<8x150xf32> to vector<8x136xf32>
    %22 = vector.extract_strided_slice %13 {offsets = [0, 8], sizes = [8, 136], strides = [1, 1]} : vector<8x150xf32> to vector<8x136xf32>
    %23 = vector.extract_strided_slice %13 {offsets = [0, 9], sizes = [8, 136], strides = [1, 1]} : vector<8x150xf32> to vector<8x136xf32>
    %24 = vector.extract_strided_slice %13 {offsets = [0, 10], sizes = [8, 136], strides = [1, 1]} : vector<8x150xf32> to vector<8x136xf32>
    %25 = vector.extract_strided_slice %13 {offsets = [0, 11], sizes = [8, 136], strides = [1, 1]} : vector<8x150xf32> to vector<8x136xf32>
    %26 = vector.extract_strided_slice %13 {offsets = [0, 12], sizes = [8, 136], strides = [1, 1]} : vector<8x150xf32> to vector<8x136xf32>
    %27 = vector.extract_strided_slice %13 {offsets = [0, 13], sizes = [8, 136], strides = [1, 1]} : vector<8x150xf32> to vector<8x136xf32>
    %28 = vector.extract_strided_slice %13 {offsets = [0, 14], sizes = [8, 136], strides = [1, 1]} : vector<8x150xf32> to vector<8x136xf32>
    %29 = tpu.concatenate %14, %15, %16, %17, %18, %19, %20, %21, %22, %23, %24, %25, %26, %27, %28 in 0 : vector<8x136xf32>, vector<8x136xf32>, vector<8x136xf32>, vector<8x136xf32>, vector<8x136xf32>, vector<8x136xf32>, vector<8x136xf32>, vector<8x136xf32>, vector<8x136xf32>, vector<8x136xf32>, vector<8x136xf32>, vector<8x136xf32>, vector<8x136xf32>, vector<8x136xf32>, vector<8x136xf32> -> vector<120x136xf32>
    %cst = arith.constant dense<0.000000e+00> : vector<16x136xf32>
    %30 = tpu.matmul %0, %29, %cst {dimension_numbers = #tpu.dot_dimension_numbers<[1], [0], [0], [1], [0, 0, 1, 1], [], []>} : vector<16x120xf32>, vector<120x136xf32>, vector<16x136xf32> -> vector<16x136xf32>
    %31 = vector.broadcast %6 : vector<16x1xf32> to vector<16x136xf32>
    %32 = arith.addf %30, %31 : vector<16x136xf32>
    %cst_16 = arith.constant 0.000000e+00 : f32
    %33 = vector.broadcast %cst_16 : f32 to vector<16x136xf32>
    %34 = arith.maximumf %32, %33 : vector<16x136xf32>
    %35 = vector.extract_strided_slice %34 {offsets = [0, 0], sizes = [16, 135], strides = [1, 1]} : vector<16x136xf32> to vector<16x135xf32>
    %36 = vector.extract_strided_slice %34 {offsets = [0, 1], sizes = [16, 135], strides = [1, 1]} : vector<16x136xf32> to vector<16x135xf32>
    %37 = arith.maximumf %35, %36 : vector<16x135xf32>
    %cst_17 = arith.constant dense<0.000000e+00> : vector<16x68xf32>
    %38 = tpu.matmul %37, %3, %cst_17 {dimension_numbers = #tpu.dot_dimension_numbers<[1], [0], [0], [1], [0, 0, 1, 1], [], []>} : vector<16x135xf32>, vector<135x68xf32>, vector<16x68xf32> -> vector<16x68xf32>
    %c0_18 = arith.constant 0 : index
    %c0_19 = arith.constant 0 : index
    %c0_20 = arith.constant 0 : index
    %39 = vector.load %arg2[%c0_18, %c0_19, %c0_20] : memref<2x16x68xf32, #tpu.memory_space<vmem>>, vector<1x16x68xf32>
    %40 = vector.shape_cast %39 : vector<1x16x68xf32> to vector<16x68xf32>
    %41 = tpu.concatenate %38, %40 in 0 : vector<16x68xf32>, vector<16x68xf32> -> vector<32x68xf32>
    %42 = vector.extract_strided_slice %41 {offsets = [0, 0], sizes = [32, 60], strides = [1, 1]} : vector<32x68xf32> to vector<32x60xf32>
    %43 = vector.extract_strided_slice %41 {offsets = [0, 1], sizes = [32, 60], strides = [1, 1]} : vector<32x68xf32> to vector<32x60xf32>
    %44 = vector.extract_strided_slice %41 {offsets = [0, 2], sizes = [32, 60], strides = [1, 1]} : vector<32x68xf32> to vector<32x60xf32>
    %45 = vector.extract_strided_slice %41 {offsets = [0, 3], sizes = [32, 60], strides = [1, 1]} : vector<32x68xf32> to vector<32x60xf32>
    %46 = vector.extract_strided_slice %41 {offsets = [0, 4], sizes = [32, 60], strides = [1, 1]} : vector<32x68xf32> to vector<32x60xf32>
    %47 = vector.extract_strided_slice %41 {offsets = [0, 5], sizes = [32, 60], strides = [1, 1]} : vector<32x68xf32> to vector<32x60xf32>
    %48 = vector.extract_strided_slice %41 {offsets = [0, 6], sizes = [32, 60], strides = [1, 1]} : vector<32x68xf32> to vector<32x60xf32>
    %49 = vector.extract_strided_slice %41 {offsets = [0, 7], sizes = [32, 60], strides = [1, 1]} : vector<32x68xf32> to vector<32x60xf32>
    %50 = vector.extract_strided_slice %41 {offsets = [0, 8], sizes = [32, 60], strides = [1, 1]} : vector<32x68xf32> to vector<32x60xf32>
    %51 = tpu.concatenate %42, %43, %44, %45, %46, %47, %48, %49, %50 in 0 : vector<32x60xf32>, vector<32x60xf32>, vector<32x60xf32>, vector<32x60xf32>, vector<32x60xf32>, vector<32x60xf32>, vector<32x60xf32>, vector<32x60xf32>, vector<32x60xf32> -> vector<288x60xf32>
    %cst_21 = arith.constant dense<0.000000e+00> : vector<8x60xf32>
    %52 = tpu.matmul %1, %51, %cst_21 {dimension_numbers = #tpu.dot_dimension_numbers<[1], [0], [0], [1], [0, 0, 1, 1], [], []>} : vector<8x288xf32>, vector<288x60xf32>, vector<8x60xf32> -> vector<8x60xf32>
    %53 = vector.broadcast %7 : vector<8x1xf32> to vector<8x60xf32>
    %54 = arith.addf %52, %53 : vector<8x60xf32>
    %cst_22 = arith.constant 0.000000e+00 : f32
    %55 = vector.broadcast %cst_22 : f32 to vector<8x60xf32>
    %56 = arith.maximumf %54, %55 : vector<8x60xf32>
    %57 = vector.extract_strided_slice %56 {offsets = [0, 0], sizes = [8, 59], strides = [1, 1]} : vector<8x60xf32> to vector<8x59xf32>
    %58 = vector.extract_strided_slice %56 {offsets = [0, 1], sizes = [8, 59], strides = [1, 1]} : vector<8x60xf32> to vector<8x59xf32>
    %59 = arith.maximumf %57, %58 : vector<8x59xf32>
    %cst_23 = arith.constant dense<0.000000e+00> : vector<8x30xf32>
    %60 = tpu.matmul %59, %4, %cst_23 {dimension_numbers = #tpu.dot_dimension_numbers<[1], [0], [0], [1], [0, 0, 1, 1], [], []>} : vector<8x59xf32>, vector<59x30xf32>, vector<8x30xf32> -> vector<8x30xf32>
    %c0_24 = arith.constant 0 : index
    %c0_25 = arith.constant 0 : index
    %c0_26 = arith.constant 0 : index
    %61 = vector.load %arg3[%c0_24, %c0_25, %c0_26] : memref<2x8x30xf32, #tpu.memory_space<vmem>>, vector<1x8x30xf32>
    %62 = vector.shape_cast %61 : vector<1x8x30xf32> to vector<8x30xf32>
    %63 = tpu.concatenate %60, %62 in 0 : vector<8x30xf32>, vector<8x30xf32> -> vector<16x30xf32>
    %64 = vector.extract_strided_slice %63 {offsets = [0, 0], sizes = [16, 26], strides = [1, 1]} : vector<16x30xf32> to vector<16x26xf32>
    %65 = vector.extract_strided_slice %63 {offsets = [0, 1], sizes = [16, 26], strides = [1, 1]} : vector<16x30xf32> to vector<16x26xf32>
    %66 = vector.extract_strided_slice %63 {offsets = [0, 2], sizes = [16, 26], strides = [1, 1]} : vector<16x30xf32> to vector<16x26xf32>
    %67 = vector.extract_strided_slice %63 {offsets = [0, 3], sizes = [16, 26], strides = [1, 1]} : vector<16x30xf32> to vector<16x26xf32>
    %68 = vector.extract_strided_slice %63 {offsets = [0, 4], sizes = [16, 26], strides = [1, 1]} : vector<16x30xf32> to vector<16x26xf32>
    %69 = tpu.concatenate %64, %65, %66, %67, %68 in 0 : vector<16x26xf32>, vector<16x26xf32>, vector<16x26xf32>, vector<16x26xf32>, vector<16x26xf32> -> vector<80x26xf32>
    %cst_27 = arith.constant dense<0.000000e+00> : vector<8x26xf32>
    %70 = tpu.matmul %2, %69, %cst_27 {dimension_numbers = #tpu.dot_dimension_numbers<[1], [0], [0], [1], [0, 0, 1, 1], [], []>} : vector<8x80xf32>, vector<80x26xf32>, vector<8x26xf32> -> vector<8x26xf32>
    %71 = vector.broadcast %8 : vector<8x1xf32> to vector<8x26xf32>
    %72 = arith.addf %70, %71 : vector<8x26xf32>
    %cst_28 = arith.constant 0.000000e+00 : f32
    %73 = vector.broadcast %cst_28 : f32 to vector<8x26xf32>
    %74 = arith.maximumf %72, %73 : vector<8x26xf32>
    %75 = vector.extract_strided_slice %74 {offsets = [0, 0], sizes = [8, 25], strides = [1, 1]} : vector<8x26xf32> to vector<8x25xf32>
    %76 = vector.extract_strided_slice %74 {offsets = [0, 1], sizes = [8, 25], strides = [1, 1]} : vector<8x26xf32> to vector<8x25xf32>
    %77 = arith.maximumf %75, %76 : vector<8x25xf32>
    %78 = vector.extract_strided_slice %77 {offsets = [0, 0], sizes = [1, 25], strides = [1, 1]} : vector<8x25xf32> to vector<1x25xf32>
    %c0_29 = arith.constant 0 : index
    %c0_30 = arith.constant 0 : index
    %79 = vector.load %arg14[%c0_29, %c0_30] : memref<2x200xf32, #tpu.memory_space<vmem>>, vector<1x25xf32>
    tpu.vector_store %arg14[%c0_29, %c0_30], %78 {strides = array<i32>} : memref<2x200xf32, #tpu.memory_space<vmem>>, vector<1x25xf32>,
    %80 = vector.extract_strided_slice %77 {offsets = [1, 0], sizes = [1, 25], strides = [1, 1]} : vector<8x25xf32> to vector<1x25xf32>
    %c0_31 = arith.constant 0 : index
    %c25 = arith.constant 25 : index
    %81 = vector.load %arg14[%c0_31, %c25] : memref<2x200xf32, #tpu.memory_space<vmem>>, vector<1x25xf32>
    tpu.vector_store %arg14[%c0_31, %c25], %80 {strides = array<i32>} : memref<2x200xf32, #tpu.memory_space<vmem>>, vector<1x25xf32>,
    %82 = vector.extract_strided_slice %77 {offsets = [2, 0], sizes = [1, 25], strides = [1, 1]} : vector<8x25xf32> to vector<1x25xf32>
    %c0_32 = arith.constant 0 : index
    %c50 = arith.constant 50 : index
    %83 = vector.load %arg14[%c0_32, %c50] : memref<2x200xf32, #tpu.memory_space<vmem>>, vector<1x25xf32>
    tpu.vector_store %arg14[%c0_32, %c50], %82 {strides = array<i32>} : memref<2x200xf32, #tpu.memory_space<vmem>>, vector<1x25xf32>,
    %84 = vector.extract_strided_slice %77 {offsets = [3, 0], sizes = [1, 25], strides = [1, 1]} : vector<8x25xf32> to vector<1x25xf32>
    %c0_33 = arith.constant 0 : index
    %c75 = arith.constant 75 : index
    %85 = vector.load %arg14[%c0_33, %c75] : memref<2x200xf32, #tpu.memory_space<vmem>>, vector<1x25xf32>
    tpu.vector_store %arg14[%c0_33, %c75], %84 {strides = array<i32>} : memref<2x200xf32, #tpu.memory_space<vmem>>, vector<1x25xf32>,
    %86 = vector.extract_strided_slice %77 {offsets = [4, 0], sizes = [1, 25], strides = [1, 1]} : vector<8x25xf32> to vector<1x25xf32>
    %c0_34 = arith.constant 0 : index
    %c100 = arith.constant 100 : index
    %87 = vector.load %arg14[%c0_34, %c100] : memref<2x200xf32, #tpu.memory_space<vmem>>, vector<1x25xf32>
    tpu.vector_store %arg14[%c0_34, %c100], %86 {strides = array<i32>} : memref<2x200xf32, #tpu.memory_space<vmem>>, vector<1x25xf32>,
    %88 = vector.extract_strided_slice %77 {offsets = [5, 0], sizes = [1, 25], strides = [1, 1]} : vector<8x25xf32> to vector<1x25xf32>
    %c0_35 = arith.constant 0 : index
    %c125 = arith.constant 125 : index
    %89 = vector.load %arg14[%c0_35, %c125] : memref<2x200xf32, #tpu.memory_space<vmem>>, vector<1x25xf32>
    tpu.vector_store %arg14[%c0_35, %c125], %88 {strides = array<i32>} : memref<2x200xf32, #tpu.memory_space<vmem>>, vector<1x25xf32>,
    %90 = vector.extract_strided_slice %77 {offsets = [6, 0], sizes = [1, 25], strides = [1, 1]} : vector<8x25xf32> to vector<1x25xf32>
    %c0_36 = arith.constant 0 : index
    %c150 = arith.constant 150 : index
    %91 = vector.load %arg14[%c0_36, %c150] : memref<2x200xf32, #tpu.memory_space<vmem>>, vector<1x25xf32>
    tpu.vector_store %arg14[%c0_36, %c150], %90 {strides = array<i32>} : memref<2x200xf32, #tpu.memory_space<vmem>>, vector<1x25xf32>,
    %92 = vector.extract_strided_slice %77 {offsets = [7, 0], sizes = [1, 25], strides = [1, 1]} : vector<8x25xf32> to vector<1x25xf32>
    %c0_37 = arith.constant 0 : index
    %c175 = arith.constant 175 : index
    %93 = vector.load %arg14[%c0_37, %c175] : memref<2x200xf32, #tpu.memory_space<vmem>>, vector<1x25xf32>
    tpu.vector_store %arg14[%c0_37, %c175], %92 {strides = array<i32>} : memref<2x200xf32, #tpu.memory_space<vmem>>, vector<1x25xf32>,
    %c1 = arith.constant 1 : index
    %c0_38 = arith.constant 0 : index
    %c0_39 = arith.constant 0 : index
    %94 = vector.load %arg1[%c1, %c0_38, %c0_39] : memref<2x8x150xf32, #tpu.memory_space<vmem>>, vector<1x8x150xf32>
    %95 = vector.shape_cast %94 : vector<1x8x150xf32> to vector<8x150xf32>
    %96 = vector.extract_strided_slice %95 {offsets = [0, 0], sizes = [8, 136], strides = [1, 1]} : vector<8x150xf32> to vector<8x136xf32>
    %97 = vector.extract_strided_slice %95 {offsets = [0, 1], sizes = [8, 136], strides = [1, 1]} : vector<8x150xf32> to vector<8x136xf32>
    %98 = vector.extract_strided_slice %95 {offsets = [0, 2], sizes = [8, 136], strides = [1, 1]} : vector<8x150xf32> to vector<8x136xf32>
    %99 = vector.extract_strided_slice %95 {offsets = [0, 3], sizes = [8, 136], strides = [1, 1]} : vector<8x150xf32> to vector<8x136xf32>
    %100 = vector.extract_strided_slice %95 {offsets = [0, 4], sizes = [8, 136], strides = [1, 1]} : vector<8x150xf32> to vector<8x136xf32>
    %101 = vector.extract_strided_slice %95 {offsets = [0, 5], sizes = [8, 136], strides = [1, 1]} : vector<8x150xf32> to vector<8x136xf32>
    %102 = vector.extract_strided_slice %95 {offsets = [0, 6], sizes = [8, 136], strides = [1, 1]} : vector<8x150xf32> to vector<8x136xf32>
    %103 = vector.extract_strided_slice %95 {offsets = [0, 7], sizes = [8, 136], strides = [1, 1]} : vector<8x150xf32> to vector<8x136xf32>
    %104 = vector.extract_strided_slice %95 {offsets = [0, 8], sizes = [8, 136], strides = [1, 1]} : vector<8x150xf32> to vector<8x136xf32>
    %105 = vector.extract_strided_slice %95 {offsets = [0, 9], sizes = [8, 136], strides = [1, 1]} : vector<8x150xf32> to vector<8x136xf32>
    %106 = vector.extract_strided_slice %95 {offsets = [0, 10], sizes = [8, 136], strides = [1, 1]} : vector<8x150xf32> to vector<8x136xf32>
    %107 = vector.extract_strided_slice %95 {offsets = [0, 11], sizes = [8, 136], strides = [1, 1]} : vector<8x150xf32> to vector<8x136xf32>
    %108 = vector.extract_strided_slice %95 {offsets = [0, 12], sizes = [8, 136], strides = [1, 1]} : vector<8x150xf32> to vector<8x136xf32>
    %109 = vector.extract_strided_slice %95 {offsets = [0, 13], sizes = [8, 136], strides = [1, 1]} : vector<8x150xf32> to vector<8x136xf32>
    %110 = vector.extract_strided_slice %95 {offsets = [0, 14], sizes = [8, 136], strides = [1, 1]} : vector<8x150xf32> to vector<8x136xf32>
    %111 = tpu.concatenate %96, %97, %98, %99, %100, %101, %102, %103, %104, %105, %106, %107, %108, %109, %110 in 0 : vector<8x136xf32>, vector<8x136xf32>, vector<8x136xf32>, vector<8x136xf32>, vector<8x136xf32>, vector<8x136xf32>, vector<8x136xf32>, vector<8x136xf32>, vector<8x136xf32>, vector<8x136xf32>, vector<8x136xf32>, vector<8x136xf32>, vector<8x136xf32>, vector<8x136xf32>, vector<8x136xf32> -> vector<120x136xf32>
    %cst_40 = arith.constant dense<0.000000e+00> : vector<16x136xf32>
    %112 = tpu.matmul %0, %111, %cst_40 {dimension_numbers = #tpu.dot_dimension_numbers<[1], [0], [0], [1], [0, 0, 1, 1], [], []>} : vector<16x120xf32>, vector<120x136xf32>, vector<16x136xf32> -> vector<16x136xf32>
    %113 = vector.broadcast %6 : vector<16x1xf32> to vector<16x136xf32>
    %114 = arith.addf %112, %113 : vector<16x136xf32>
    %cst_41 = arith.constant 0.000000e+00 : f32
    %115 = vector.broadcast %cst_41 : f32 to vector<16x136xf32>
    %116 = arith.maximumf %114, %115 : vector<16x136xf32>
    %117 = vector.extract_strided_slice %116 {offsets = [0, 0], sizes = [16, 135], strides = [1, 1]} : vector<16x136xf32> to vector<16x135xf32>
    %118 = vector.extract_strided_slice %116 {offsets = [0, 1], sizes = [16, 135], strides = [1, 1]} : vector<16x136xf32> to vector<16x135xf32>
    %119 = arith.maximumf %117, %118 : vector<16x135xf32>
    %cst_42 = arith.constant dense<0.000000e+00> : vector<16x68xf32>
    %120 = tpu.matmul %119, %3, %cst_42 {dimension_numbers = #tpu.dot_dimension_numbers<[1], [0], [0], [1], [0, 0, 1, 1], [], []>} : vector<16x135xf32>, vector<135x68xf32>, vector<16x68xf32> -> vector<16x68xf32>
    %c1_43 = arith.constant 1 : index
    %c0_44 = arith.constant 0 : index
    %c0_45 = arith.constant 0 : index
    %121 = vector.load %arg2[%c1_43, %c0_44, %c0_45] : memref<2x16x68xf32, #tpu.memory_space<vmem>>, vector<1x16x68xf32>
    %122 = vector.shape_cast %121 : vector<1x16x68xf32> to vector<16x68xf32>
    %123 = tpu.concatenate %120, %122 in 0 : vector<16x68xf32>, vector<16x68xf32> -> vector<32x68xf32>
    %124 = vector.extract_strided_slice %123 {offsets = [0, 0], sizes = [32, 60], strides = [1, 1]} : vector<32x68xf32> to vector<32x60xf32>
    %125 = vector.extract_strided_slice %123 {offsets = [0, 1], sizes = [32, 60], strides = [1, 1]} : vector<32x68xf32> to vector<32x60xf32>
    %126 = vector.extract_strided_slice %123 {offsets = [0, 2], sizes = [32, 60], strides = [1, 1]} : vector<32x68xf32> to vector<32x60xf32>
    %127 = vector.extract_strided_slice %123 {offsets = [0, 3], sizes = [32, 60], strides = [1, 1]} : vector<32x68xf32> to vector<32x60xf32>
    %128 = vector.extract_strided_slice %123 {offsets = [0, 4], sizes = [32, 60], strides = [1, 1]} : vector<32x68xf32> to vector<32x60xf32>
    %129 = vector.extract_strided_slice %123 {offsets = [0, 5], sizes = [32, 60], strides = [1, 1]} : vector<32x68xf32> to vector<32x60xf32>
    %130 = vector.extract_strided_slice %123 {offsets = [0, 6], sizes = [32, 60], strides = [1, 1]} : vector<32x68xf32> to vector<32x60xf32>
    %131 = vector.extract_strided_slice %123 {offsets = [0, 7], sizes = [32, 60], strides = [1, 1]} : vector<32x68xf32> to vector<32x60xf32>
    %132 = vector.extract_strided_slice %123 {offsets = [0, 8], sizes = [32, 60], strides = [1, 1]} : vector<32x68xf32> to vector<32x60xf32>
    %133 = tpu.concatenate %124, %125, %126, %127, %128, %129, %130, %131, %132 in 0 : vector<32x60xf32>, vector<32x60xf32>, vector<32x60xf32>, vector<32x60xf32>, vector<32x60xf32>, vector<32x60xf32>, vector<32x60xf32>, vector<32x60xf32>, vector<32x60xf32> -> vector<288x60xf32>
    %cst_46 = arith.constant dense<0.000000e+00> : vector<8x60xf32>
    %134 = tpu.matmul %1, %133, %cst_46 {dimension_numbers = #tpu.dot_dimension_numbers<[1], [0], [0], [1], [0, 0, 1, 1], [], []>} : vector<8x288xf32>, vector<288x60xf32>, vector<8x60xf32> -> vector<8x60xf32>
    %135 = vector.broadcast %7 : vector<8x1xf32> to vector<8x60xf32>
    %136 = arith.addf %134, %135 : vector<8x60xf32>
    %cst_47 = arith.constant 0.000000e+00 : f32
    %137 = vector.broadcast %cst_47 : f32 to vector<8x60xf32>
    %138 = arith.maximumf %136, %137 : vector<8x60xf32>
    %139 = vector.extract_strided_slice %138 {offsets = [0, 0], sizes = [8, 59], strides = [1, 1]} : vector<8x60xf32> to vector<8x59xf32>
    %140 = vector.extract_strided_slice %138 {offsets = [0, 1], sizes = [8, 59], strides = [1, 1]} : vector<8x60xf32> to vector<8x59xf32>
    %141 = arith.maximumf %139, %140 : vector<8x59xf32>
    %cst_48 = arith.constant dense<0.000000e+00> : vector<8x30xf32>
    %142 = tpu.matmul %141, %4, %cst_48 {dimension_numbers = #tpu.dot_dimension_numbers<[1], [0], [0], [1], [0, 0, 1, 1], [], []>} : vector<8x59xf32>, vector<59x30xf32>, vector<8x30xf32> -> vector<8x30xf32>
    %c1_49 = arith.constant 1 : index
    %c0_50 = arith.constant 0 : index
    %c0_51 = arith.constant 0 : index
    %143 = vector.load %arg3[%c1_49, %c0_50, %c0_51] : memref<2x8x30xf32, #tpu.memory_space<vmem>>, vector<1x8x30xf32>
    %144 = vector.shape_cast %143 : vector<1x8x30xf32> to vector<8x30xf32>
    %145 = tpu.concatenate %142, %144 in 0 : vector<8x30xf32>, vector<8x30xf32> -> vector<16x30xf32>
    %146 = vector.extract_strided_slice %145 {offsets = [0, 0], sizes = [16, 26], strides = [1, 1]} : vector<16x30xf32> to vector<16x26xf32>
    %147 = vector.extract_strided_slice %145 {offsets = [0, 1], sizes = [16, 26], strides = [1, 1]} : vector<16x30xf32> to vector<16x26xf32>
    %148 = vector.extract_strided_slice %145 {offsets = [0, 2], sizes = [16, 26], strides = [1, 1]} : vector<16x30xf32> to vector<16x26xf32>
    %149 = vector.extract_strided_slice %145 {offsets = [0, 3], sizes = [16, 26], strides = [1, 1]} : vector<16x30xf32> to vector<16x26xf32>
    %150 = vector.extract_strided_slice %145 {offsets = [0, 4], sizes = [16, 26], strides = [1, 1]} : vector<16x30xf32> to vector<16x26xf32>
    %151 = tpu.concatenate %146, %147, %148, %149, %150 in 0 : vector<16x26xf32>, vector<16x26xf32>, vector<16x26xf32>, vector<16x26xf32>, vector<16x26xf32> -> vector<80x26xf32>
    %cst_52 = arith.constant dense<0.000000e+00> : vector<8x26xf32>
    %152 = tpu.matmul %2, %151, %cst_52 {dimension_numbers = #tpu.dot_dimension_numbers<[1], [0], [0], [1], [0, 0, 1, 1], [], []>} : vector<8x80xf32>, vector<80x26xf32>, vector<8x26xf32> -> vector<8x26xf32>
    %153 = vector.broadcast %8 : vector<8x1xf32> to vector<8x26xf32>
    %154 = arith.addf %152, %153 : vector<8x26xf32>
    %cst_53 = arith.constant 0.000000e+00 : f32
    %155 = vector.broadcast %cst_53 : f32 to vector<8x26xf32>
    %156 = arith.maximumf %154, %155 : vector<8x26xf32>
    %157 = vector.extract_strided_slice %156 {offsets = [0, 0], sizes = [8, 25], strides = [1, 1]} : vector<8x26xf32> to vector<8x25xf32>
    %158 = vector.extract_strided_slice %156 {offsets = [0, 1], sizes = [8, 25], strides = [1, 1]} : vector<8x26xf32> to vector<8x25xf32>
    %159 = arith.maximumf %157, %158 : vector<8x25xf32>
    %160 = vector.extract_strided_slice %159 {offsets = [0, 0], sizes = [1, 25], strides = [1, 1]} : vector<8x25xf32> to vector<1x25xf32>
    %c1_54 = arith.constant 1 : index
    %c0_55 = arith.constant 0 : index
    %161 = vector.load %arg14[%c1_54, %c0_55] : memref<2x200xf32, #tpu.memory_space<vmem>>, vector<1x25xf32>
    tpu.vector_store %arg14[%c1_54, %c0_55], %160 {strides = array<i32>} : memref<2x200xf32, #tpu.memory_space<vmem>>, vector<1x25xf32>,
    %162 = vector.extract_strided_slice %159 {offsets = [1, 0], sizes = [1, 25], strides = [1, 1]} : vector<8x25xf32> to vector<1x25xf32>
    %c1_56 = arith.constant 1 : index
    %c25_57 = arith.constant 25 : index
    %163 = vector.load %arg14[%c1_56, %c25_57] : memref<2x200xf32, #tpu.memory_space<vmem>>, vector<1x25xf32>
    tpu.vector_store %arg14[%c1_56, %c25_57], %162 {strides = array<i32>} : memref<2x200xf32, #tpu.memory_space<vmem>>, vector<1x25xf32>,
    %164 = vector.extract_strided_slice %159 {offsets = [2, 0], sizes = [1, 25], strides = [1, 1]} : vector<8x25xf32> to vector<1x25xf32>
    %c1_58 = arith.constant 1 : index
    %c50_59 = arith.constant 50 : index
    %165 = vector.load %arg14[%c1_58, %c50_59] : memref<2x200xf32, #tpu.memory_space<vmem>>, vector<1x25xf32>
    tpu.vector_store %arg14[%c1_58, %c50_59], %164 {strides = array<i32>} : memref<2x200xf32, #tpu.memory_space<vmem>>, vector<1x25xf32>,
    %166 = vector.extract_strided_slice %159 {offsets = [3, 0], sizes = [1, 25], strides = [1, 1]} : vector<8x25xf32> to vector<1x25xf32>
    %c1_60 = arith.constant 1 : index
    %c75_61 = arith.constant 75 : index
    %167 = vector.load %arg14[%c1_60, %c75_61] : memref<2x200xf32, #tpu.memory_space<vmem>>, vector<1x25xf32>
    tpu.vector_store %arg14[%c1_60, %c75_61], %166 {strides = array<i32>} : memref<2x200xf32, #tpu.memory_space<vmem>>, vector<1x25xf32>,
    %168 = vector.extract_strided_slice %159 {offsets = [4, 0], sizes = [1, 25], strides = [1, 1]} : vector<8x25xf32> to vector<1x25xf32>
    %c1_62 = arith.constant 1 : index
    %c100_63 = arith.constant 100 : index
    %169 = vector.load %arg14[%c1_62, %c100_63] : memref<2x200xf32, #tpu.memory_space<vmem>>, vector<1x25xf32>
    tpu.vector_store %arg14[%c1_62, %c100_63], %168 {strides = array<i32>} : memref<2x200xf32, #tpu.memory_space<vmem>>, vector<1x25xf32>,
    %170 = vector.extract_strided_slice %159 {offsets = [5, 0], sizes = [1, 25], strides = [1, 1]} : vector<8x25xf32> to vector<1x25xf32>
    %c1_64 = arith.constant 1 : index
    %c125_65 = arith.constant 125 : index
    %171 = vector.load %arg14[%c1_64, %c125_65] : memref<2x200xf32, #tpu.memory_space<vmem>>, vector<1x25xf32>
    tpu.vector_store %arg14[%c1_64, %c125_65], %170 {strides = array<i32>} : memref<2x200xf32, #tpu.memory_space<vmem>>, vector<1x25xf32>,
    %172 = vector.extract_strided_slice %159 {offsets = [6, 0], sizes = [1, 25], strides = [1, 1]} : vector<8x25xf32> to vector<1x25xf32>
    %c1_66 = arith.constant 1 : index
    %c150_67 = arith.constant 150 : index
    %173 = vector.load %arg14[%c1_66, %c150_67] : memref<2x200xf32, #tpu.memory_space<vmem>>, vector<1x25xf32>
    tpu.vector_store %arg14[%c1_66, %c150_67], %172 {strides = array<i32>} : memref<2x200xf32, #tpu.memory_space<vmem>>, vector<1x25xf32>,
    %174 = vector.extract_strided_slice %159 {offsets = [7, 0], sizes = [1, 25], strides = [1, 1]} : vector<8x25xf32> to vector<1x25xf32>
    %c1_68 = arith.constant 1 : index
    %c175_69 = arith.constant 175 : index
    %175 = vector.load %arg14[%c1_68, %c175_69] : memref<2x200xf32, #tpu.memory_space<vmem>>, vector<1x25xf32>
    tpu.vector_store %arg14[%c1_68, %c175_69], %174 {strides = array<i32>} : memref<2x200xf32, #tpu.memory_space<vmem>>, vector<1x25xf32>,
    %c0_70 = arith.constant 0 : index
    %c0_71 = arith.constant 0 : index
    %176 = vector.load %arg14[%c0_70, %c0_71] : memref<2x200xf32, #tpu.memory_space<vmem>>, vector<2x200xf32>
    %c0_72 = arith.constant 0 : index
    %c0_73 = arith.constant 0 : index
    %177 = vector.load %arg10[%c0_72, %c0_73] : memref<200x96xf32, #tpu.memory_space<vmem>>, vector<200x96xf32>
    %cst_74 = arith.constant dense<0.000000e+00> : vector<2x96xf32>
    %178 = tpu.matmul %176, %177, %cst_74 {dimension_numbers = #tpu.dot_dimension_numbers<[1], [0], [0], [1], [0, 0, 1, 1], [], []>} : vector<2x200xf32>, vector<200x96xf32>, vector<2x96xf32> -> vector<2x96xf32>
    %179 = vector.broadcast %10 : vector<1x96xf32> to vector<2x96xf32>
    %180 = arith.addf %178, %179 : vector<2x96xf32>
    %cst_75 = arith.constant 0.000000e+00 : f32
    %181 = vector.broadcast %cst_75 : f32 to vector<2x96xf32>
    %182 = arith.maximumf %180, %181 : vector<2x96xf32>
    %c0_76 = arith.constant 0 : index
    %c0_77 = arith.constant 0 : index
    %183 = vector.load %arg11[%c0_76, %c0_77] : memref<96x128xf32, #tpu.memory_space<vmem>>, vector<96x128xf32>
    %cst_78 = arith.constant dense<0.000000e+00> : vector<2x128xf32>
    %184 = tpu.matmul %182, %183, %cst_78 {dimension_numbers = #tpu.dot_dimension_numbers<[1], [0], [0], [1], [0, 0, 1, 1], [], []>} : vector<2x96xf32>, vector<96x128xf32>, vector<2x128xf32> -> vector<2x128xf32>
    %185 = vector.broadcast %11 : vector<1x128xf32> to vector<2x128xf32>
    %186 = arith.addf %184, %185 : vector<2x128xf32>
    %c0_79 = arith.constant 0 : index
    %c0_80 = arith.constant 0 : index
    %c0_81 = arith.constant 0 : index
    %187 = vector.load %arg13[%c0_79, %c0_80, %c0_81] : memref<1x2x128xf32, #tpu.memory_space<vmem>>, vector<1x2x128xf32>
    %188 = vector.shape_cast %187 : vector<1x2x128xf32> to vector<2x128xf32>
    %189 = vector.shape_cast %186 : vector<2x128xf32> to vector<1x2x128xf32>
    tpu.vector_store %arg13[%c0_79, %c0_80, %c0_81], %189 {strides = array<i32>} : memref<1x2x128xf32, #tpu.memory_space<vmem>>, vector<1x2x128xf32>,
    return
  }
  func.func @transform_0(%arg0: i32) -> (i32, i32, i32) {
    %c0_i32 = arith.constant 0 : i32
    %c0_i32_0 = arith.constant 0 : i32
    %c0_i32_1 = arith.constant 0 : i32
    return %arg0, %c0_i32, %c0_i32_0 : i32, i32, i32
  }
  func.func @transform_1(%arg0: i32) -> (i32, i32, i32) {
    %c0_i32 = arith.constant 0 : i32
    %c0_i32_0 = arith.constant 0 : i32
    %c0_i32_1 = arith.constant 0 : i32
    return %arg0, %c0_i32, %c0_i32_0 : i32, i32, i32
  }
  func.func @transform_2(%arg0: i32) -> (i32, i32, i32) {
    %c0_i32 = arith.constant 0 : i32
    %c0_i32_0 = arith.constant 0 : i32
    %c0_i32_1 = arith.constant 0 : i32
    return %arg0, %c0_i32, %c0_i32_0 : i32, i32, i32
  }
  func.func @transform_3(%arg0: i32) -> (i32, i32) {
    %c0_i32 = arith.constant 0 : i32
    %c0_i32_0 = arith.constant 0 : i32
    %c0_i32_1 = arith.constant 0 : i32
    return %c0_i32, %c0_i32_0 : i32, i32
  }
  func.func @transform_4(%arg0: i32) -> (i32, i32) {
    %c0_i32 = arith.constant 0 : i32
    %c0_i32_0 = arith.constant 0 : i32
    %c0_i32_1 = arith.constant 0 : i32
    return %c0_i32, %c0_i32_0 : i32, i32
  }
  func.func @transform_5(%arg0: i32) -> (i32, i32) {
    %c0_i32 = arith.constant 0 : i32
    %c0_i32_0 = arith.constant 0 : i32
    %c0_i32_1 = arith.constant 0 : i32
    return %c0_i32, %c0_i32_0 : i32, i32
  }
  func.func @transform_6(%arg0: i32) -> (i32, i32) {
    %c0_i32 = arith.constant 0 : i32
    %c0_i32_0 = arith.constant 0 : i32
    %c0_i32_1 = arith.constant 0 : i32
    return %c0_i32, %c0_i32_0 : i32, i32
  }
  func.func @transform_7(%arg0: i32) -> (i32, i32) {
    %c0_i32 = arith.constant 0 : i32
    %c0_i32_0 = arith.constant 0 : i32
    %c0_i32_1 = arith.constant 0 : i32
    return %c0_i32, %c0_i32_0 : i32, i32
  }
  func.func @transform_8(%arg0: i32) -> (i32, i32) {
    %c0_i32 = arith.constant 0 : i32
    %c0_i32_0 = arith.constant 0 : i32
    %c0_i32_1 = arith.constant 0 : i32
    return %c0_i32, %c0_i32_0 : i32, i32
  }
  func.func @transform_9(%arg0: i32) -> (i32, i32) {
    %c0_i32 = arith.constant 0 : i32
    %c0_i32_0 = arith.constant 0 : i32
    %c0_i32_1 = arith.constant 0 : i32
    return %c0_i32, %c0_i32_0 : i32, i32
  }
  func.func @transform_10(%arg0: i32) -> (i32, i32) {
    %c0_i32 = arith.constant 0 : i32
    %c0_i32_0 = arith.constant 0 : i32
    %c0_i32_1 = arith.constant 0 : i32
    return %c0_i32, %c0_i32_0 : i32, i32
  }
  func.func @transform_11(%arg0: i32) -> (i32, i32) {
    %c0_i32 = arith.constant 0 : i32
    %c0_i32_0 = arith.constant 0 : i32
    %c0_i32_1 = arith.constant 0 : i32
    return %c0_i32, %c0_i32_0 : i32, i32
  }
  func.func @transform_12(%arg0: i32) -> (i32, i32, i32) {
    %c0_i32 = arith.constant 0 : i32
    %c0_i32_0 = arith.constant 0 : i32
    %c0_i32_1 = arith.constant 0 : i32
    return %arg0, %c0_i32, %c0_i32_0 : i32, i32, i32
  }
}

</mosaic_0001>

<bundles_post_ra>
// kernel: tpu_custom_call.1
= control target key start
LH: loop header
LB: loop body
LE: loop exit
PB: predicated region body
PF: predicated region fallthrough
CT: control target
= control target key end

     0   :  { %s2499_s0 = inlined_call_operand.vmem [shape: f32[2,8,150], index: 0, kind: input, shape index: {}]   ;;  %s2500_s1 = inlined_call_operand.vmem [shape: f32[2,16,68], index: 1, kind: input, shape index: {}]   ;;  %s2501_s2 = inlined_call_operand.vmem [shape: f32[2,8,30], index: 2, kind: input, shape index: {}]   ;;  %s2502_s3 = inlined_call_operand.vmem [shape: f32[16,120], index: 3, kind: input, shape index: {}]   ;;  %s2503_s4 = inlined_call_operand.vmem [shape: f32[8,288], index: 4, kind: input, shape index: {}]   ;;  %s2504_s5 = inlined_call_operand.vmem [shape: f32[8,80], index: 5, kind: input, shape index: {}]   ;;  %s2505_s6 = inlined_call_operand.vmem [shape: f32[32,1], index: 6, kind: input, shape index: {}]   ;;  %s2506_s7 = inlined_call_operand.vmem [shape: f32[135,68], index: 7, kind: input, shape index: {}]   ;;  %s2507_s8 = inlined_call_operand.vmem [shape: f32[59,30], index: 8, kind: input, shape index: {}]   ;;  %s2508_s9 = inlined_call_operand.vmem [shape: f32[200,96], index: 9, kind: input, shape index: {}]   ;;  %s2509_s10 = inlined_call_operand.vmem [shape: f32[96,128], index: 10, kind: input, shape index: {}]   ;;  %s2510_s11 = inlined_call_operand.vmem [shape: f32[1,224], index: 11, kind: input, shape index: {}]   ;;  %s2511_s12 = inlined_call_operand.hbm [shape: f32[1,2,128], index: 12, kind: output, shape index: {}]  }
   0x1   :  { %v1863_v0 = vld [vmem:[%s2499_s0] sm:$0xff]  ;;  %v1868_v1 = vld [vmem:[%s2499_s0 + $0x8] sm:$0xff] }
   0x2   :  { %17 = vsyncpa [#allocation4], 0  ;;  %v1403_v2 = vpack.i.bf16 %v1868_v1, %v1863_v0  ;;  %s2513_s25 = smov 114   ;;  %s1773_s26 = smov 116   ;;  %vm190_vm0 = vcmask 932864   ;;  %vm182_vm1 = vcmask 941056  }
   0x3   :  { %s1774_s27 = smov 118   ;;  %s1775_s28 = smov 115   ;;  %vm174_vm2 = vcmask 949248   ;;  %vm166_vm3 = vcmask 957440   ;;  %vm158_vm4 = vcmask 965632   ;;  %vm150_vm5 = vcmask 973824  }
   0x4   :  { %1404 = vrot.lane.b32.xlu0 %v1403_v2, %s2513_s25  ;;  %1414 = vrot.lane.b32.xlu1 %v1403_v2, %s1773_s26  ;;  %s2512_s29 = smov 117   ;;  %s2514_s30 = smov 119   ;;  %v74_v31 = vld [vmem:[%s2505_s6 + $0x8] sm:$0xff]  ;;  %vm142_vm6 = vcmask 982016   ;;  %v1786_v37 = vmov 0   ;;  %v73_v38 = vld [vmem:[%s2505_s6] sm:$0xff] }
   0x5   :  { %1424 = vrot.lane.b32.xlu2 %v1403_v2, %s1774_s27  ;;  %s1778_s13 = smov 120   ;;  %s1779_s14 = smov 121   ;;  %1474 = vset.pattern.permute.xlu0 %v1786_v37  ;;  %vm134_vm7 = vcmask 990208   ;;  %vm126_vm8 = vcmask 998400   ;;  %vm118_vm9 = vcmask 1006592   ;;  %vm110_vm10 = vcmask 1014784  }
   0x6   :  { %s1780_s15 = smov 122   ;;  %s1781_s16 = smov 123   ;;  %1473 = vset.pattern.permute.xlu2 %v1786_v37  ;;  %1555 = vset.pattern.permute.xlu1 %v1786_v37  ;;  %vm102_vm11 = vcmask 1022976   ;;  %vm94_vm12 = vcmask 1031168   ;;  %vm86_vm13 = vcmask 1039360   ;;  %v1909_v62 = vld [vmem:[%s2502_s3] sm:$0xff] }
   0x7   :  { %s1782_s17 = smov 124   ;;  %s1783_s18 = smov 125   ;;  %v1920_v63 = vld [vmem:[%s2502_s3 + $0x8] sm:$0xff]  ;;  %vm289_vm14 = vcmask 1046528   ;;  %vm2515_vm15 = vcmask 56320  }
   0x8   :  { %s1784_s19 = smov 126   ;;  %s1785_s20 = smov 127  }
   0x9   :  { %s2517_s23 = smov 114  }
   0xc   :  { %1409 = vrot.lane.b32.xlu0 %v1403_v2, %s1775_s28  ;;  %1419 = vrot.lane.b32.xlu1 %v1403_v2, %s2512_s29  ;;  %s2516_s29 = smov 119  }
   0xd   :  { %1429 = vrot.lane.b32.xlu2 %v1403_v2, %s2514_s30 }
  0x14   :  { %1434 = vrot.lane.b32.xlu0 %v1403_v2, %s1778_s13  ;;  %1439 = vrot.lane.b32.xlu1 %v1403_v2, %s1779_s14 }
  0x15   :  { %1444 = vrot.lane.b32.xlu2 %v1403_v2, %s1780_s15 }
  0x1c   :  { %1449 = vrot.lane.b32.xlu0 %v1403_v2, %s1781_s16  ;;  %1454 = vrot.lane.b32.xlu1 %v1403_v2, %s1782_s17 }
  0x1d   :  { %1459 = vrot.lane.b32.xlu2 %v1403_v2, %s1783_s18 }
  0x24   :  { %1464 = vrot.lane.b32.xlu0 %v1403_v2, %s1784_s19  ;;  %1469 = vrot.lane.b32.xlu1 %v1403_v2, %s1785_s20 }
  0x25   :  { %196 = vperm.xlu2 %1473, %v73_v38  }
  0x2c   :  { %201 = vperm.xlu0 %1474, %v74_v31  }
  0x5f   :  { %v1425_v3 = vpop.permute.xlu2 %1424 }
  0x60   :  { %v1426_v20 = vunpack.i.l.bf16 %v1425_v3  ;;  %v1427_v22 = vunpack.i.h.bf16 %v1425_v3 }
  0x62   :  { %v159_v29 = vsel %vm158_vm4, %v1426_v20, %v1427_v22  ;;  %v1977_v20 = vld [vmem:[%s2506_s7 + $0x50] sm:$0xff] }
  0x67   :  { %v1430_v8 = vpop.permute.xlu2 %1429 }
  0x68   :  { %v1431_v23 = vunpack.i.l.bf16 %v1430_v8  ;;  %v1432_v24 = vunpack.i.h.bf16 %v1430_v8 }
  0x6a   :  { %v151_v32 = vsel %vm150_vm5, %v1431_v23, %v1432_v24  ;;  %v1995_v23 = vld [vmem:[%s2506_s7 + $0x38] sm:$0xff] }
  0x6f   :  { %v1445_v19 = vpop.permute.xlu2 %1444 }
  0x70   :  { %v1446_v34 = vunpack.i.l.bf16 %v1445_v19  ;;  %v1447_v36 = vunpack.i.h.bf16 %v1445_v19  ;;  %v1971_v19 = vld [vmem:[%s2506_s7 + $0x58] sm:$0xff] }
  0x72   :  { %v127_v42 = vsel %vm126_vm8, %v1446_v34, %v1447_v36 }
  0x76   :  { %v1405_v4 = vpop.permute.xlu0 %1404  ;;  %v1415_v5 = vpop.permute.xlu1 %1414 }
  0x77   :  { %v1406_v6 = vunpack.i.l.bf16 %v1405_v4  ;;  %v1407_v7 = vunpack.i.h.bf16 %v1405_v4  ;;  %v1416_v12 = vunpack.i.l.bf16 %v1415_v5  ;;  %v1417_v15 = vunpack.i.h.bf16 %v1415_v5  ;;  %v1460_v40 = vpop.permute.xlu2 %1459 }
  0x78   :  { %v1461_v45 = vunpack.i.l.bf16 %v1460_v40  ;;  %v1462_v46 = vunpack.i.h.bf16 %v1460_v40 }
  0x79   :  { %234 = vmatpush.msra.mxu1 %v1407_v7  ;;  %v191_v9 = vsel %vm190_vm0, %v1406_v6, %v1407_v7  ;;  %v175_v21 = vsel %vm174_vm2, %v1416_v12, %v1417_v15 }
  0x7a   :  { %211 = vmatpush.msra.mxu0 %v191_v9  ;;  %v103_v53 = vsel %vm102_vm11, %v1461_v45, %v1462_v46 }
  0x7e   :  { %v1410_v10 = vpop.permute.xlu0 %1409  ;;  %v1420_v11 = vpop.permute.xlu1 %1419 }
  0x7f   :  { %v1411_v13 = vunpack.i.l.bf16 %v1410_v10  ;;  %v1412_v14 = vunpack.i.h.bf16 %v1410_v10  ;;  %v1421_v16 = vunpack.i.l.bf16 %v1420_v11  ;;  %v1422_v18 = vunpack.i.h.bf16 %v1420_v11  ;;  %v1938_v2 = vpop.permute.xlu2 %196 }
  0x81   :  { %235 = vmatpush.msra.mxu1 %v1412_v14  ;;  %v183_v17 = vsel %vm182_vm1, %v1411_v13, %v1412_v14  ;;  %v167_v25 = vsel %vm166_vm3, %v1421_v16, %v1422_v18  ;;  %v1953_v16 = vld [vmem:[%s2506_s7 + $0x68] sm:$0xff] }
  0x82   :  { %212 = vmatpush.msra.mxu0 %v183_v17  ;;  %v1958_v17 = vld [vmem:[%s2506_s7 + $0x80] sm:$0x7f] }
  0x83   :  { %236 = vmatpush.msra.mxu1 %v1417_v15  ;;  %1347 = vmatpush.msk.msra.mxu3 %vm289_vm14, %v1958_v17 }
  0x84   :  { %213 = vmatpush.msra.mxu0 %v175_v21  ;;  %v1984_v21 = vld [vmem:[%s2506_s7 + $0x48] sm:$0xff] }
  0x85   :  { %237 = vmatpush.msra.mxu1 %v1422_v18  ;;  %v1966_v18 = vld [vmem:[%s2506_s7 + $0x60] sm:$0xff] }
  0x86   :  { %v1435_v26 = vpop.permute.xlu0 %1434  ;;  %214 = vmatpush.msra.mxu0 %v167_v25  ;;  %v1440_v27 = vpop.permute.xlu1 %1439  ;;  %v2007_v25 = vld [vmem:[%s2506_s7 + $0x28] sm:$0xff] }
  0x87   :  { %v1436_v28 = vunpack.i.l.bf16 %v1435_v26  ;;  %238 = vmatpush.msra.mxu1 %v1427_v22  ;;  %v1437_v30 = vunpack.i.h.bf16 %v1435_v26  ;;  %v1441_v33 = vunpack.i.l.bf16 %v1440_v27  ;;  %v1442_v35 = vunpack.i.h.bf16 %v1440_v27  ;;  %v1990_v22 = vld [vmem:[%s2506_s7 + $0x40] sm:$0xff]  ;;  %v2019_v27 = vld [vmem:[%s2506_s7 + $0x18] sm:$0xff] }
  0x88   :  { %215 = vmatpush.msra.mxu0 %v159_v29  ;;  %v2013_v26 = vld [vmem:[%s2506_s7 + $0x20] sm:$0xff]  ;;  %v2032_v29 = vld [vmem:[%s2506_s7 + $0x8] sm:$0xff] }
  0x89   :  { %239 = vmatpush.msra.mxu1 %v1432_v24  ;;  %v143_v39 = vsel %vm142_vm6, %v1436_v28, %v1437_v30  ;;  %v135_v41 = vsel %vm134_vm7, %v1441_v33, %v1442_v35  ;;  %v2001_v24 = vld [vmem:[%s2506_s7 + $0x30] sm:$0xff] }
  0x8a   :  { %216 = vmatpush.msra.mxu0 %v151_v32  ;;  %v2025_v28 = vld [vmem:[%s2506_s7 + $0x10] sm:$0xff] }
  0x8b   :  { %240 = vmatpush.msra.mxu1 %v1437_v30  ;;  %v2038_v30 = vld [vmem:[%s2506_s7] sm:$0xff] }
  0x8c   :  { %217 = vmatpush.msra.mxu0 %v143_v39 }
  0x8d   :  { %241 = vmatpush.msra.mxu1 %v1442_v35 }
  0x8e   :  { %v1450_v43 = vpop.permute.xlu0 %1449  ;;  %218 = vmatpush.msra.mxu0 %v135_v41  ;;  %v1455_v44 = vpop.permute.xlu1 %1454  ;;  %v2048_v41 = vld [vmem:[%s2500_s1] sm:$0xff] }
  0x8f   :  { %v1451_v47 = vunpack.i.l.bf16 %v1450_v43  ;;  %242 = vmatpush.msra.mxu1 %v1447_v36  ;;  %v1456_v48 = vunpack.i.l.bf16 %v1455_v44  ;;  %v1452_v49 = vunpack.i.h.bf16 %v1450_v43  ;;  %v1457_v50 = vunpack.i.h.bf16 %v1455_v44 }
  0x90   :  { %219 = vmatpush.msra.mxu0 %v127_v42  ;;  %v2053_v42 = vld [vmem:[%s2500_s1 + $0x8] sm:$0xff] }
  0x91   :  { %243 = vmatpush.msra.mxu1 %v1452_v49  ;;  %v119_v51 = vsel %vm118_vm9, %v1451_v47, %v1452_v49  ;;  %v111_v52 = vsel %vm110_vm10, %v1456_v48, %v1457_v50  ;;  %v1480_v43 = vpack.i.bf16 %v2048_v41, %v2053_v42 }
  0x92   :  { %220 = vmatpush.msra.mxu0 %v119_v51 }
  0x93   :  { %244 = vmatpush.msra.mxu1 %v1457_v50  ;;  %1476 = vrot.lane.b32.xlu0 %v1480_v43, %s1783_s18 }
  0x94   :  { %221 = vmatpush.msra.mxu0 %v111_v52 }
  0x95   :  { %245 = vmatpush.msra.mxu1 %v1462_v46 }
  0x96   :  { %v1465_v54 = vpop.permute.xlu0 %1464  ;;  %v1470_v55 = vpop.permute.xlu1 %1469  ;;  %222 = vmatpush.msra.mxu0 %v103_v53 }
  0x97   :  { %v1466_v56 = vunpack.i.l.bf16 %v1465_v54  ;;  %v1471_v57 = vunpack.i.l.bf16 %v1470_v55  ;;  %v1467_v58 = vunpack.i.h.bf16 %v1465_v54  ;;  %v1472_v59 = vunpack.i.h.bf16 %v1470_v55 }
  0x99   :  { %246 = vmatpush.msra.mxu1 %v1467_v58  ;;  %v95_v60 = vsel %vm94_vm12, %v1466_v56, %v1467_v58  ;;  %v87_v61 = vsel %vm86_vm13, %v1471_v57, %v1472_v59 }
  0x9a   :  { %223 = vmatpush.msra.mxu0 %v95_v60 }
  0x9b   :  { %247 = vmatpush.msra.mxu1 %v1472_v59 }
  0x9c   :  { %224 = vmatpush.msra.mxu0 %v87_v61 }
  0x9d   :  { %248 = vmatpush.msra.mxu1 %v1868_v1  ;;  %v1934_v1 = vld [vmem:[%s2506_s7 + $0x70] sm:$0xff] }
  0x9e   :  { %225 = vmatpush.msra.mxu0 %v1863_v0  ;;  %1345 = vmatmul.msk.f32.vlgmr.msra.gmra.mxu1 %vm142_vm6, %v1909_v62  ;;  %v1929_v0 = vld [vmem:[%s2506_s7 + $0x78] sm:$0xff]  ;;  %v1944_v9 = vpop.permute.xlu0 %201 }
  0x9f   :  { %1343 = vmatmul.msk.f32.vlgmr.msra.gmra.mxu0 %vm142_vm6, %v1909_v62  ;;  %293 = vmatpush.msra.mxu2 %v1929_v0 }
  0xa1   :  { %294 = vmatpush.msra.mxu2 %v1934_v1 }
  0xa3   :  { %295 = vmatpush.msra.mxu2 %v1953_v16 }
  0xa5   :  { %296 = vmatpush.msra.mxu2 %v1966_v18 }
  0xa6   :  { %1346 = vmatmul.msk.f32.gmra.mxu1 %vm142_vm6, %v1920_v63 }
  0xa7   :  { %1344 = vmatmul.msk.f32.gmra.mxu0 %vm142_vm6, %v1920_v63  ;;  %297 = vmatpush.msra.mxu2 %v1971_v19 }
  0xa9   :  { %298 = vmatpush.msra.mxu2 %v1977_v20 }
  0xab   :  { %299 = vmatpush.msra.mxu2 %v1984_v21 }
  0xad   :  { %300 = vmatpush.msra.mxu2 %v1990_v22 }
  0xaf   :  { %301 = vmatpush.msra.mxu2 %v1995_v23 }
  0xb1   :  { %302 = vmatpush.msra.mxu2 %v2001_v24 }
  0xb3   :  { %303 = vmatpush.msra.mxu2 %v2007_v25 }
  0xb5   :  { %304 = vmatpush.msra.mxu2 %v2013_v26 }
  0xb7   :  { %305 = vmatpush.msra.mxu2 %v2019_v27 }
  0xb9   :  { %306 = vmatpush.msra.mxu2 %v2025_v28 }
  0xbb   :  { %307 = vmatpush.msra.mxu2 %v2032_v29 }
  0xbd   :  { %308 = vmatpush.msra.mxu2 %v2038_v30 }
 0x105   :  { %v1477_v51 = vpop.permute.xlu0 %1476 }
 0x106   :  { %v1478_v52 = vunpack.i.l.bf16 %v1477_v51  ;;  %v1479_v53 = vunpack.i.h.bf16 %v1477_v51 }
 0x108   :  { %450 = vmatpush.msrb.mxu3 %v1478_v52  ;;  %v2106_v52 = vld [vmem:[%s2503_s4] sm:$0xff] }
 0x10a   :  { %451 = vmatpush.msrb.mxu3 %v1479_v53 }
 0x11b   :  { %v250_v3 = vpop.f32.mrf.mxu1 }
 0x11c   :  { %v251_v4 = vadd.f32 %v250_v3, %v1938_v2  ;;  %v227_v5 = vpop.f32.mrf.mxu0 }
 0x11d   :  { %v228_v6 = vadd.f32 %v227_v5, %v1938_v2 }
 0x11e   :  { %v257_v7 = vmax.f32 %v251_v4, 0.0 }
 0x11f   :  { %v256_v8 = vmax.f32 %v228_v6, 0.0 }
 0x120   :  { %266 = vrot.lane.b32.xlu2 %v257_v7, %s1785_s20 }
 0x121   :  { %264 = vrot.lane.b32.xlu1 %v256_v8, %s1785_s20 }
 0x123   :  { %v253_v10 = vpop.f32.mrf.mxu1 }
 0x124   :  { %v254_v11 = vadd.f32 %v253_v10, %v1944_v9  ;;  %v230_v12 = vpop.f32.mrf.mxu0  ;;  %v2085_v10 = vld [vmem:[%s2499_s0 + $0x10] sm:$0xff] }
 0x125   :  { %v231_v13 = vadd.f32 %v230_v12, %v1944_v9 }
 0x126   :  { %v259_v14 = vmax.f32 %v254_v11, 0.0  ;;  %v2090_v11 = vld [vmem:[%s2499_s0 + $0x18] sm:$0xff] }
 0x127   :  { %v258_v15 = vmax.f32 %v231_v13, 0.0 }
 0x128   :  { %270 = vrot.lane.b32.xlu2 %v259_v14, %s1785_s20 }
 0x129   :  { %268 = vrot.lane.b32.xlu1 %v258_v15, %s1785_s20 }
 0x130   :  { %1481 = vrot.lane.b32.xlu2 %v1480_v43, %s1784_s19 }
 0x138   :  { %1496 = vrot.lane.b32.xlu2 %v1480_v43, %s1785_s20 }
 0x140   :  { %1501 = vrot.lane.b32.xlu2 %v1480_v43, %s1780_s15 }
 0x17a   :  { %v267_v31 = vpop.permute.xlu2 %266 }
 0x17b   :  { %v279_v32 = vmax.f32 %v257_v7, %v267_v31 }
 0x17d   :  { %1348 = vmatmul.msk.f32.vlgmr.msra.gmra.mxu3 %vm2515_vm15, %v279_v32 }
 0x182   :  { %v271_v33 = vpop.permute.xlu2 %270 }
 0x183   :  { %v281_v34 = vmax.f32 %v259_v14, %v271_v33  ;;  %v2094_v14 = vpack.i.bf16 %v2090_v11, %v2085_v10 }
 0x185   :  { %1349 = vmatmul.msk.f32.gmra.mxu3 %vm2515_vm15, %v281_v34  ;;  %vm446_vm15 = vcmask 261120  }
 0x18a   :  { %v1482_v54 = vpop.permute.xlu2 %1481 }
 0x18b   :  { %v1483_v60 = vunpack.i.l.bf16 %v1482_v54  ;;  %v1484_v3 = vunpack.i.h.bf16 %v1482_v54 }
 0x192   :  { %v1497_v56 = vpop.permute.xlu2 %1496 }
 0x193   :  { %v265_v35 = vpop.permute.xlu1 %264 }
 0x194   :  { %v272_v36 = vsel %vm86_vm13, %v265_v35, %v267_v31 }
 0x195   :  { %v278_v37 = vmax.f32 %v256_v8, %v272_v36  ;;  %v75_v8 = vld [vmem:[%s2505_s6 + $0x10] sm:$0xff] }
 0x197   :  { %309 = vmatmul.f32.vlgmr.msra.gmra.mxu2 %v278_v37 }
 0x19a   :  { %v1502_v7 = vpop.permute.xlu2 %1501 }
 0x19b   :  { %v269_v38 = vpop.permute.xlu1 %268  ;;  %v1503_v35 = vunpack.i.l.bf16 %v1502_v7 }
 0x19c   :  { %v273_v39 = vsel %vm86_vm13, %v269_v38, %v271_v33  ;;  %v1499_v33 = vunpack.i.h.bf16 %v1497_v56 }
 0x19d   :  { %v280_v40 = vmax.f32 %v258_v15, %v273_v39  ;;  %v1498_v15 = vunpack.i.l.bf16 %v1497_v56  ;;  %v1504_v39 = vunpack.i.h.bf16 %v1502_v7  ;;  %v2162_v7 = vld [vmem:[%s2507_s8 + $0x20] sm:$0xff] }
 0x19f   :  { %312 = vmatmul.f32.gmra.mxu2 %v280_v40 }
 0x200   :  { %v333_v44 = vpop.f32.mrf.mxu3 }
 0x208   :  { %v336_v46 = vpop.f32.mrf.mxu3 }
 0x21a   :  { %v310_v45 = vpop.f32.mrf.mxu2 }
 0x21b   :  { %v2061_v48 = vadd.f32 %v333_v44, %v310_v45 }
 0x222   :  { %v313_v47 = vpop.f32.mrf.mxu2 }
 0x223   :  { %v2063_v49 = vadd.f32 %v336_v46, %v313_v47 }
 0x225   :  { %v1540_v50 = vpack.i.bf16 %v2061_v48, %v2063_v49 }
 0x227   :  { %1541 = vrot.lane.b32.xlu2 %v1540_v50, %s1781_s16  ;;  %1506 = vrot.lane.b32.xlu0 %v1540_v50, %s1784_s19 }
 0x228   :  { %1486 = vrot.lane.b32.xlu1 %v1540_v50, %s1783_s18 }
 0x22f   :  { %1546 = vrot.lane.b32.xlu2 %v1540_v50, %s1778_s13  ;;  %1511 = vrot.lane.b32.xlu0 %v1540_v50, %s1779_s14 }
 0x230   :  { %1491 = vrot.lane.b32.xlu1 %v1480_v43, %s1779_s14 }
 0x237   :  { %1526 = vrot.lane.b32.xlu0 %v1540_v50, %s1780_s15  ;;  %1557 = vrot.lane.b32.xlu2 %v2094_v14, %s2517_s23 }
 0x238   :  { %1516 = vrot.lane.b32.xlu1 %v1540_v50, %s1785_s20 }
 0x23f   :  { %1531 = vrot.lane.b32.xlu0 %v1480_v43, %s1778_s13 }
 0x240   :  { %1521 = vrot.lane.b32.xlu1 %v1480_v43, %s1781_s16 }
 0x247   :  { %1551 = vrot.lane.b32.xlu0 %v1540_v50, %s1782_s17 }
 0x248   :  { %1536 = vrot.lane.b32.xlu1 %v1480_v43, %s1782_s17 }
 0x24f   :  { %1562 = vrot.lane.b32.xlu0 %v2094_v14, %s1775_s28 }
 0x250   :  { %443 = vperm.xlu1 %1555, %v75_v8  }
 0x257   :  { %1577 = vrot.lane.b32.xlu0 %v2094_v14, %s1774_s27 }
 0x258   :  { %1567 = vrot.lane.b32.xlu1 %v2094_v14, %s1773_s26 }
 0x25f   :  { %1592 = vrot.lane.b32.xlu0 %v2094_v14, %s1779_s14 }
 0x260   :  { %1582 = vrot.lane.b32.xlu1 %v2094_v14, %s2516_s29 }
 0x267   :  { %1602 = vrot.lane.b32.xlu0 %v2094_v14, %s1781_s16 }
 0x26f   :  { %1617 = vrot.lane.b32.xlu0 %v2094_v14, %s1784_s19 }
 0x281   :  { %v1542_v40 = vpop.permute.xlu2 %1541 }
 0x289   :  { %v1547_v54 = vpop.permute.xlu2 %1546 }
 0x299   :  { %v1507_v55 = vpop.permute.xlu0 %1506 }
 0x29a   :  { %v1487_v57 = vpop.permute.xlu1 %1486  ;;  %v1508_v5 = vunpack.i.l.bf16 %v1507_v55  ;;  %v1509_v12 = vunpack.i.h.bf16 %v1507_v55 }
 0x29b   :  { %v1488_v58 = vunpack.i.l.bf16 %v1487_v57  ;;  %v1489_v59 = vunpack.i.h.bf16 %v1487_v57 }
 0x29d   :  { %452 = vmatpush.msrb.mxu3 %v1488_v58  ;;  %v1549_v58 = vunpack.i.h.bf16 %v1547_v54 }
 0x29f   :  { %453 = vmatpush.msrb.mxu3 %v1489_v59 }
 0x2a1   :  { %454 = vmatpush.msrb.mxu3 %v1483_v60  ;;  %v1512_v61 = vpop.permute.xlu0 %1511 }
 0x2a2   :  { %v1492_v4 = vpop.permute.xlu1 %1491  ;;  %v1513_v31 = vunpack.i.l.bf16 %v1512_v61  ;;  %v1514_v34 = vunpack.i.h.bf16 %v1512_v61 }
 0x2a3   :  { %455 = vmatpush.msrb.mxu3 %v1484_v3  ;;  %v1493_v6 = vunpack.i.l.bf16 %v1492_v4  ;;  %v1494_v13 = vunpack.i.h.bf16 %v1492_v4  ;;  %v2120_v3 = vld [vmem:[%s2503_s4 + $0x8] sm:$0xff]  ;;  %v2147_v4 = vld [vmem:[%s2507_s8 + $0x30] sm:$0xff] }
 0x2a5   :  { %456 = vmatpush.msrb.mxu3 %v1508_v5  ;;  %470 = vmatpush.msrb.mxu0 %v1493_v6  ;;  %v2156_v5 = vld [vmem:[%s2507_s8 + $0x28] sm:$0xff] }
 0x2a7   :  { %457 = vmatpush.msrb.mxu3 %v1509_v12  ;;  %471 = vmatpush.msrb.mxu0 %v1494_v13  ;;  %v2170_v12 = vld [vmem:[%s2507_s8 + $0x18] sm:$0xff] }
 0x2a9   :  { %458 = vmatpush.msrb.mxu3 %v1498_v15  ;;  %472 = vmatpush.msrb.mxu0 %v1513_v31  ;;  %v1527_v32 = vpop.permute.xlu0 %1526  ;;  %v2177_v15 = vld [vmem:[%s2507_s8 + $0x10] sm:$0xff] }
 0x2aa   :  { %v1517_v36 = vpop.permute.xlu1 %1516  ;;  %v1528_v43 = vunpack.i.l.bf16 %v1527_v32  ;;  %v1529_v44 = vunpack.i.h.bf16 %v1527_v32 }
 0x2ab   :  { %459 = vmatpush.msrb.mxu3 %v1499_v33  ;;  %473 = vmatpush.msrb.mxu0 %v1514_v34  ;;  %v1518_v37 = vunpack.i.l.bf16 %v1517_v36  ;;  %v1519_v38 = vunpack.i.h.bf16 %v1517_v36  ;;  %v2185_v33 = vld [vmem:[%s2507_s8 + $0x8] sm:$0xff] }
 0x2ad   :  { %460 = vmatpush.msrb.mxu3 %v1518_v37  ;;  %474 = vmatpush.msrb.mxu0 %v1503_v35  ;;  %v2204_v37 = vld [vmem:[%s2507_s8] sm:$0xff] }
 0x2af   :  { %461 = vmatpush.msrb.mxu3 %v1519_v38  ;;  %475 = vmatpush.msrb.mxu0 %v1504_v39 }
 0x2b1   :  { %462 = vmatpush.msrb.mxu3 %v2053_v42  ;;  %476 = vmatpush.msrb.mxu0 %v1528_v43  ;;  %v1532_v45 = vpop.permute.xlu0 %1531  ;;  %v1543_v42 = vunpack.i.l.bf16 %v1542_v40 }
 0x2b2   :  { %v1522_v46 = vpop.permute.xlu1 %1521  ;;  %v1533_v50 = vunpack.i.l.bf16 %v1532_v45  ;;  %v1534_v53 = vunpack.i.h.bf16 %v1532_v45 }
 0x2b3   :  { %463 = vmatpush.msrb.mxu3 %v2048_v41  ;;  %477 = vmatpush.msrb.mxu0 %v1529_v44  ;;  %v1523_v47 = vunpack.i.l.bf16 %v1522_v46  ;;  %v1524_v51 = vunpack.i.h.bf16 %v1522_v46  ;;  %v1544_v41 = vunpack.i.h.bf16 %v1542_v40  ;;  %v1558_v44 = vpop.permute.xlu2 %1557 }
 0x2b4   :  { %v1560_v45 = vunpack.i.h.bf16 %v1558_v44  ;;  %v1559_v46 = vunpack.i.l.bf16 %v1558_v44 }
 0x2b5   :  { %464 = vmatpush.msrb.mxu3 %v2063_v49  ;;  %478 = vmatpush.msrb.mxu0 %v1523_v47  ;;  %v1548_v49 = vunpack.i.l.bf16 %v1547_v54 }
 0x2b7   :  { %465 = vmatpush.msrb.mxu3 %v2061_v48  ;;  %479 = vmatpush.msrb.mxu0 %v1524_v51  ;;  %v2113_v48 = vld [vmem:[%s2503_s4 + $0x10] sm:$0xff]  ;;  %s2518_s4 = smov 117   ;;  %v774_v51 = vsel %vm190_vm0, %v1559_v46, %v1560_v45  ;;  %vm516_vm0 = vcmask 482304  }
 0x2b8   :  { %466 = vmatmul.f32.vlgmr.msrb.gmra.mxu3 %v2106_v52  ;;  %1572 = vrot.lane.b32.xlu2 %v2094_v14, %s2518_s4 }
 0x2b9   :  { %502 = vmatpush.msra.mxu3 %v1533_v50  ;;  %480 = vmatpush.msrb.mxu0 %v1543_v42  ;;  %v1552_v57 = vpop.permute.xlu0 %1551 }
 0x2ba   :  { %v1537_v55 = vpop.permute.xlu1 %1536  ;;  %v1553_v60 = vunpack.i.l.bf16 %v1552_v57  ;;  %v1554_v61 = vunpack.i.h.bf16 %v1552_v57 }
 0x2bb   :  { %503 = vmatpush.msra.mxu3 %v1534_v53  ;;  %481 = vmatpush.msrb.mxu0 %v1544_v41  ;;  %v1538_v56 = vunpack.i.l.bf16 %v1537_v55  ;;  %v1539_v59 = vunpack.i.h.bf16 %v1537_v55 }
 0x2bd   :  { %504 = vmatpush.msra.mxu3 %v1548_v49  ;;  %482 = vmatpush.msrb.mxu0 %v1538_v56 }
 0x2bf   :  { %505 = vmatpush.msra.mxu3 %v1549_v58  ;;  %483 = vmatpush.msrb.mxu0 %v1539_v59 }
 0x2c0   :  { %1350 = vmatmul.msk.f32.vlgmr.msra.gmra.mxu3 %vm446_vm15, %v2113_v48  ;;  %1587 = vrot.lane.b32.xlu2 %v2094_v14, %s1778_s13 }
 0x2c1   :  { %484 = vmatpush.msrb.mxu0 %v1553_v60  ;;  %v1563_v38 = vpop.permute.xlu0 %1562  ;;  %778 = vmatpush.msrb.mxu3 %v774_v51 }
 0x2c2   :  { %v2164_v8 = vpop.permute.xlu1 %443  ;;  %v1565_v40 = vunpack.i.h.bf16 %v1563_v38  ;;  %v1564_v43 = vunpack.i.l.bf16 %v1563_v38 }
 0x2c3   :  { %485 = vmatpush.msrb.mxu0 %v1554_v61 }
 0x2c4   :  { %486 = vmatmul.f32.vlgmr.msrb.gmra.mxu0 %v2120_v3 }
 0x2c5   :  { %1364 = vmatpush.msk.msra.mxu0 %vm289_vm14, %v1958_v17  ;;  %v2142_v17 = vld [vmem:[%s2507_s8 + $0x38] sm:$0x7]  ;;  %vm520_vm14 = vcmask 1042432  }
 0x2c6   :  { %1351 = vmatpush.msk.msrb.mxu1 %vm520_vm14, %v2142_v17 }
 0x2c8   :  { %533 = vmatpush.msrb.mxu1 %v2147_v4  ;;  %1597 = vrot.lane.b32.xlu2 %v2094_v14, %s1780_s15 }
 0x2c9   :  { %v1578_v49 = vpop.permute.xlu0 %1577 }
 0x2ca   :  { %534 = vmatpush.msrb.mxu1 %v2156_v5  ;;  %v1568_v39 = vpop.permute.xlu1 %1567  ;;  %v1580_v57 = vunpack.i.h.bf16 %v1578_v49  ;;  %v1579_v58 = vunpack.i.l.bf16 %v1578_v49 }
 0x2cb   :  { %v1570_v47 = vunpack.i.h.bf16 %v1568_v39  ;;  %v1569_v50 = vunpack.i.l.bf16 %v1568_v39 }
 0x2cc   :  { %535 = vmatpush.msrb.mxu1 %v2162_v7  ;;  %v746_v61 = vsel %vm158_vm4, %v1579_v58, %v1580_v57  ;;  %vm606_vm4 = vcmask 196608  }
 0x2cd   :  { %v760_v53 = vsel %vm174_vm2, %v1569_v50, %v1570_v47  ;;  %vm2519_vm2 = vcmask 56320  }
 0x2ce   :  { %536 = vmatpush.msrb.mxu1 %v2170_v12 }
 0x2d0   :  { %537 = vmatpush.msrb.mxu1 %v2177_v15  ;;  %1612 = vrot.lane.b32.xlu2 %v2094_v14, %s1783_s18 }
 0x2d2   :  { %538 = vmatpush.msrb.mxu1 %v2185_v33  ;;  %v1583_v56 = vpop.permute.xlu1 %1582 }
 0x2d3   :  { %v1585_v59 = vunpack.i.h.bf16 %v1583_v56  ;;  %v1584_v60 = vunpack.i.l.bf16 %v1583_v56 }
 0x2d4   :  { %539 = vmatpush.msrb.mxu1 %v2204_v37 }
 0x2d6   :  { %801 = vmatpush.msra.mxu1 %v1560_v45 }
 0x2d8   :  { %802 = vmatpush.msra.mxu1 %v1565_v40 }
 0x2da   :  { %803 = vmatpush.msra.mxu1 %v1570_v47 }
 0x312   :  { %v1573_v42 = vpop.permute.xlu2 %1572 }
 0x313   :  { %v1575_v54 = vunpack.i.h.bf16 %v1573_v42  ;;  %v1574_v41 = vunpack.i.l.bf16 %v1573_v42 }
 0x315   :  { %804 = vmatpush.msra.mxu1 %v1575_v54  ;;  %v753_v55 = vsel %vm166_vm3, %v1574_v41, %v1575_v54  ;;  %vm2520_vm3 = vmmov %vm2519_vm2 }
 0x317   :  { %805 = vmatpush.msra.mxu1 %v1580_v57 }
 0x319   :  { %806 = vmatpush.msra.mxu1 %v1585_v59 }
 0x33b   :  { %v467_v6 = vpop.f32.mrf.mxu3 }
 0x33c   :  { %v468_v13 = vadd.f32 %v467_v6, %v2164_v8  ;;  %v739_v6 = vsel %vm150_vm5, %v1584_v60, %v1585_v59  ;;  %vm614_vm5 = vcmask 401608  }
 0x341   :  { %v487_v31 = vpop.f32.mrf.mxu0 }
 0x342   :  { %v488_v32 = vadd.f32 %v487_v31, %v468_v13  ;;  %v1588_v13 = vpop.permute.xlu2 %1587 }
 0x343   :  { %v507_v34 = vpop.f32.mrf.mxu3  ;;  %v1590_v31 = vunpack.i.h.bf16 %v1588_v13 }
 0x344   :  { %v2188_v35 = vadd.f32 %v507_v34, %v488_v32  ;;  %v1589_v32 = vunpack.i.l.bf16 %v1588_v13  ;;  %v1593_v34 = vpop.permute.xlu0 %1592 }
 0x345   :  { %807 = vmatpush.msra.mxu1 %v1590_v31  ;;  %v1595_v38 = vunpack.i.h.bf16 %v1593_v34  ;;  %v1594_v39 = vunpack.i.l.bf16 %v1593_v34 }
 0x346   :  { %v510_v36 = vmax.f32 %v2188_v35, 0.0 }
 0x347   :  { %808 = vmatpush.msra.mxu1 %v1595_v38  ;;  %v725_v44 = vsel %vm134_vm7, %v1594_v39, %v1595_v38  ;;  %v544_v38 = vld [vmem:[%s2501_s2] sm:$0xff]  ;;  %vm632_vm7 = vcmask 811608  }
 0x348   :  { %512 = vrot.lane.b32.xlu1 %v510_v36, %s1785_s20 }
 0x34c   :  { %v1603_v47 = vpop.permute.xlu0 %1602 }
 0x34d   :  { %v1605_v50 = vunpack.i.h.bf16 %v1603_v47  ;;  %v1604_v51 = vunpack.i.l.bf16 %v1603_v47 }
 0x350   :  { %1607 = vrot.lane.b32.xlu1 %v2094_v14, %s1782_s17 }
 0x358   :  { %1622 = vrot.lane.b32.xlu1 %v2094_v14, %s1785_s20  ;;  %v767_v14 = vsel %vm182_vm1, %v1564_v43, %v1565_v40  ;;  %v1598_v40 = vpop.permute.xlu2 %1597  ;;  %v732_v43 = vsel %vm142_vm6, %v1589_v32, %v1590_v31  ;;  %vm576_vm1 = vcmask 654336  }
 0x359   :  { %779 = vmatpush.msrb.mxu3 %v767_v14  ;;  %v1600_v45 = vunpack.i.h.bf16 %v1598_v40  ;;  %v1599_v46 = vunpack.i.l.bf16 %v1598_v40 }
 0x35b   :  { %780 = vmatpush.msrb.mxu3 %v760_v53  ;;  %809 = vmatpush.msra.mxu1 %v1600_v45  ;;  %v718_v14 = vsel %vm126_vm8, %v1599_v46, %v1600_v45  ;;  %v711_v53 = vsel %vm118_vm9, %v1604_v51, %v1605_v50  ;;  %vm652_vm8 = vcmask 1041384   ;;  %vm653_vm9 = vcmask 174082  }
 0x35d   :  { %781 = vmatpush.msrb.mxu3 %v753_v55  ;;  %810 = vmatpush.msra.mxu1 %v1605_v50  ;;  %v1618_v55 = vpop.permute.xlu0 %1617 }
 0x35e   :  { %v1620_v60 = vunpack.i.h.bf16 %v1618_v55 }
 0x35f   :  { %782 = vmatpush.msrb.mxu3 %v746_v61  ;;  %v1619_v61 = vunpack.i.l.bf16 %v1618_v55 }
 0x360   :  { %v1613_v41 = vpop.permute.xlu2 %1612 }
 0x361   :  { %783 = vmatpush.msrb.mxu3 %v739_v6  ;;  %v1615_v49 = vunpack.i.h.bf16 %v1613_v41  ;;  %v1614_v56 = vunpack.i.l.bf16 %v1613_v41  ;;  %v690_v35 = vsel %vm94_vm12, %v1619_v61, %v1620_v60  ;;  %vm2358_vm12 = vmor %vm653_vm9, %vm652_vm8 }
 0x363   :  { %784 = vmatpush.msrb.mxu3 %v732_v43  ;;  %v697_v13 = vsel %vm102_vm11, %v1614_v56, %v1615_v49 }
 0x365   :  { %785 = vmatpush.msrb.mxu3 %v725_v44 }
 0x367   :  { %786 = vmatpush.msrb.mxu3 %v718_v14 }
 0x369   :  { %787 = vmatpush.msrb.mxu3 %v711_v53 }
 0x3ba   :  { %v513_v42 = vpop.permute.xlu1 %512 }
 0x3bb   :  { %v515_v54 = vmax.f32 %v510_v36, %v513_v42 }
 0x3bd   :  { %1352 = vmatmul.msk.f32.vlgmr.msrb.gmra.mxu1 %vm516_vm0, %v515_v54 }
 0x3c2   :  { %v1608_v57 = vpop.permute.xlu1 %1607 }
 0x3c3   :  { %v1610_v58 = vunpack.i.h.bf16 %v1608_v57  ;;  %v1609_v59 = vunpack.i.l.bf16 %v1608_v57 }
 0x3c5   :  { %811 = vmatpush.msra.mxu1 %v1610_v58  ;;  %v704_v6 = vsel %vm110_vm10, %v1609_v59, %v1610_v58  ;;  %vm640_vm10 = vcmask 1016608  }
 0x3c6   :  { %788 = vmatpush.msrb.mxu3 %v704_v6 }
 0x3c7   :  { %812 = vmatpush.msra.mxu1 %v1615_v49 }
 0x3c8   :  { %789 = vmatpush.msrb.mxu3 %v697_v13 }
 0x3c9   :  { %813 = vmatpush.msra.mxu1 %v1620_v60  ;;  %v2252_v60 = vld [vmem:[%s2504_s5] sm:$0xff]  ;;  %s1793_s5 = smov 32  }
 0x3ca   :  { %v1623_v36 = vpop.permute.xlu1 %1622  ;;  %790 = vmatpush.msrb.mxu3 %v690_v35 }
 0x3cb   :  { %v1625_v31 = vunpack.i.h.bf16 %v1623_v36  ;;  %v1624_v32 = vunpack.i.l.bf16 %v1623_v36 }
 0x3cd   :  { %814 = vmatpush.msra.mxu1 %v1625_v31  ;;  %v683_v34 = vsel %vm86_vm13, %v1624_v32, %v1625_v31 }
 0x3ce   :  { %791 = vmatpush.msrb.mxu3 %v683_v34 }
 0x3cf   :  { %815 = vmatpush.msra.mxu1 %v2090_v11 }
 0x3d0   :  { %792 = vmatpush.msrb.mxu3 %v2085_v10  ;;  %1362 = vmatmul.msk.f32.vlgmr.msra.gmra.mxu1 %vm142_vm6, %v1909_v62 }
 0x3d1   :  { %1360 = vmatmul.msk.f32.vlgmr.msrb.gmra.mxu3 %vm142_vm6, %v1909_v62 }
 0x3d8   :  { %1363 = vmatmul.msk.f32.gmra.mxu1 %vm142_vm6, %v1920_v63 }
 0x3d9   :  { %1361 = vmatmul.msk.f32.gmra.mxu3 %vm142_vm6, %v1920_v63  ;;  %vm622_vm6 = vcmask 606608  }
 0x43a   :  { %v541_v39 = vpop.f32.mrf.mxu1 }
 0x43b   :  { %v1636_v11 = vpack.i.bf16 %v541_v39, %v544_v38 }
 0x43d   :  { %1637 = vrot.lane.b32.xlu1 %v1636_v11, %s1784_s19  ;;  %1632 = vrot.lane.b32.xlu0 %v1636_v11, %s1783_s18 }
 0x43e   :  { %1627 = vrot.lane.b32.xlu2 %v1636_v11, %s1782_s17 }
 0x446   :  { %1642 = vrot.lane.b32.xlu2 %v1636_v11, %s1785_s20 }
 0x44d   :  { %v817_v62 = vpop.f32.mrf.mxu1 }
 0x44e   :  { %v818_v10 = vadd.f32 %v817_v62, %v1938_v2 }
 0x450   :  { %v824_v40 = vmax.f32 %v818_v10, 0.0 }
 0x452   :  { %833 = vrot.lane.b32.xlu1 %v824_v40, %s1785_s20 }
 0x454   :  { %v794_v63 = vpop.f32.mrf.mxu3 }
 0x455   :  { %v795_v43 = vadd.f32 %v794_v63, %v1938_v2  ;;  %v820_v45 = vpop.f32.mrf.mxu1 }
 0x456   :  { %v821_v46 = vadd.f32 %v820_v45, %v1944_v9 }
 0x457   :  { %v823_v44 = vmax.f32 %v795_v43, 0.0 }
 0x458   :  { %v826_v51 = vmax.f32 %v821_v46, 0.0 }
 0x459   :  { %831 = vrot.lane.b32.xlu0 %v823_v44, %s1785_s20 }
 0x45c   :  { %v797_v47 = vpop.f32.mrf.mxu3 }
 0x45d   :  { %v798_v50 = vadd.f32 %v797_v47, %v1944_v9 }
 0x45f   :  { %v825_v14 = vmax.f32 %v798_v50, 0.0 }
 0x461   :  { %835 = vrot.lane.b32.xlu2 %v825_v14, %s1785_s20  ;;  %837 = vrot.lane.b32.xlu0 %v826_v51, %s1785_s20 }
 0x498   :  { %v1628_v53 = vpop.permute.xlu2 %1627 }
 0x499   :  { %v1629_v42 = vunpack.i.l.bf16 %v1628_v53  ;;  %v1630_v54 = vunpack.i.h.bf16 %v1628_v53 }
 0x49b   :  { %586 = vmatpush.msrb.mxu2 %v1629_v42 }
 0x49d   :  { %587 = vmatpush.msrb.mxu2 %v1630_v54 }
 0x4a0   :  { %v1643_v57 = vpop.permute.xlu2 %1642 }
 0x4a1   :  { %v1644_v58 = vunpack.i.l.bf16 %v1643_v57  ;;  %v1645_v59 = vunpack.i.h.bf16 %v1643_v57 }
 0x4af   :  { %v1633_v2 = vpop.permute.xlu0 %1632  ;;  %v1638_v55 = vpop.permute.xlu1 %1637 }
 0x4b0   :  { %v1634_v41 = vunpack.i.l.bf16 %v1633_v2  ;;  %v1635_v49 = vunpack.i.h.bf16 %v1633_v2  ;;  %v1639_v56 = vunpack.i.l.bf16 %v1638_v55  ;;  %v1640_v9 = vunpack.i.h.bf16 %v1638_v55 }
 0x4b2   :  { %588 = vmatpush.msrb.mxu2 %v1634_v41 }
 0x4b4   :  { %589 = vmatpush.msrb.mxu2 %v1635_v49 }
 0x4b6   :  { %590 = vmatpush.msrb.mxu2 %v1639_v56 }
 0x4b8   :  { %591 = vmatpush.msrb.mxu2 %v1640_v9 }
 0x4ba   :  { %592 = vmatpush.msrb.mxu2 %v1644_v58 }
 0x4bc   :  { %593 = vmatpush.msrb.mxu2 %v1645_v59 }
 0x4be   :  { %594 = vmatpush.msrb.mxu2 %v544_v38 }
 0x4c0   :  { %595 = vmatpush.msrb.mxu2 %v541_v39 }
 0x4c1   :  { %1353 = vmatmul.msk.f32.vlgmr.msrb.gmra.mxu2 %vm576_vm1, %v2252_v60 }
 0x4c2   :  { %855 = vmatpush.msra.mxu2 %v1929_v0 }
 0x4c4   :  { %856 = vmatpush.msra.mxu2 %v1934_v1  ;;  %v834_v61 = vpop.permute.xlu1 %833 }
 0x4c5   :  { %v846_v6 = vmax.f32 %v824_v40, %v834_v61 }
 0x4c6   :  { %857 = vmatpush.msra.mxu2 %v1953_v16 }
 0x4c7   :  { %1365 = vmatmul.msk.f32.vlgmr.msra.gmra.mxu0 %vm2519_vm2, %v846_v6 }
 0x4c8   :  { %858 = vmatpush.msra.mxu2 %v1966_v18 }
 0x4ca   :  { %859 = vmatpush.msra.mxu2 %v1971_v19  ;;  %v836_v19 = vpop.permute.xlu2 %835 }
 0x4cb   :  { %v832_v13 = vpop.permute.xlu0 %831 }
 0x4cc   :  { %860 = vmatpush.msra.mxu2 %v1977_v20  ;;  %v839_v16 = vsel %vm86_vm13, %v832_v13, %v834_v61 }
 0x4cd   :  { %v845_v18 = vmax.f32 %v823_v44, %v839_v16 }
 0x4ce   :  { %861 = vmatpush.msra.mxu2 %v1984_v21 }
 0x4d0   :  { %862 = vmatpush.msra.mxu2 %v1990_v22  ;;  %v2279_v22 = vld [vmem:[%s2500_s1 + $0x10] sm:$0xff] }
 0x4d2   :  { %863 = vmatpush.msra.mxu2 %v1995_v23  ;;  %v2284_v23 = vld [vmem:[%s2500_s1 + $0x18] sm:$0xff] }
 0x4d3   :  { %v838_v0 = vpop.permute.xlu0 %837 }
 0x4d4   :  { %864 = vmatpush.msra.mxu2 %v2001_v24  ;;  %v848_v1 = vmax.f32 %v826_v51, %v838_v0  ;;  %v840_v20 = vsel %vm86_vm13, %v836_v19, %v838_v0  ;;  %v1651_v24 = vpack.i.bf16 %v2279_v22, %v2284_v23  ;;  %vm662_vm13 = vcmask 377008  }
 0x4d5   :  { %v847_v21 = vmax.f32 %v825_v14, %v840_v20 }
 0x4d6   :  { %865 = vmatpush.msra.mxu2 %v2007_v25  ;;  %1366 = vmatmul.msk.f32.gmra.mxu0 %vm2520_vm3, %v848_v1 }
 0x4d7   :  { %1652 = vrot.lane.b32.xlu2 %v1651_v24, %s1783_s18  ;;  %1647 = vrot.lane.b32.xlu1 %v1651_v24, %s1779_s14 }
 0x4d8   :  { %866 = vmatpush.msra.mxu2 %v2013_v26 }
 0x4da   :  { %867 = vmatpush.msra.mxu2 %v2019_v27 }
 0x4dc   :  { %868 = vmatpush.msra.mxu2 %v2025_v28 }
 0x4de   :  { %869 = vmatpush.msra.mxu2 %v2032_v29 }
 0x4df   :  { %1657 = vrot.lane.b32.xlu2 %v1651_v24, %s1780_s15 }
 0x4e0   :  { %870 = vmatpush.msra.mxu2 %v2038_v30 }
 0x4e1   :  { %871 = vmatmul.f32.vlgmr.msra.gmra.mxu2 %v845_v18 }
 0x4e9   :  { %874 = vmatmul.f32.gmra.mxu2 %v847_v21 }
 0x531   :  { %v1653_v31 = vpop.permute.xlu2 %1652 }
 0x532   :  { %v1655_v32 = vunpack.i.h.bf16 %v1653_v31  ;;  %v1654_v34 = vunpack.i.l.bf16 %v1653_v31 }
 0x534   :  { %1004 = vmatpush.msrb.mxu0 %v1654_v34 }
 0x536   :  { %1005 = vmatpush.msrb.mxu0 %v1655_v32 }
 0x539   :  { %v1658_v62 = vpop.permute.xlu2 %1657 }
 0x53a   :  { %v1659_v45 = vunpack.i.l.bf16 %v1658_v62  ;;  %v1660_v50 = vunpack.i.h.bf16 %v1658_v62 }
 0x544   :  { %v2291_v25 = vpop.f32.mrf.mxu2  ;;  %v895_v26 = vpop.f32.mrf.mxu0 }
 0x549   :  { %v1648_v38 = vpop.permute.xlu1 %1647 }
 0x54a   :  { %v1650_v39 = vunpack.i.h.bf16 %v1648_v38  ;;  %v1649_v11 = vunpack.i.l.bf16 %v1648_v38 }
 0x54c   :  { %1024 = vmatpush.msra.mxu3 %v1649_v11 }
 0x54e   :  { %1025 = vmatpush.msra.mxu3 %v1650_v39 }
 0x553   :  { %v898_v28 = vpop.f32.mrf.mxu0 }
 0x564   :  { %v872_v27 = vpop.f32.mrf.mxu2 }
 0x565   :  { %v2293_v30 = vadd.f32 %v895_v26, %v872_v27 }
 0x56c   :  { %v875_v29 = vpop.f32.mrf.mxu2 }
 0x56d   :  { %v2295_v35 = vadd.f32 %v898_v28, %v875_v29 }
 0x56f   :  { %v1696_v36 = vpack.i.bf16 %v2293_v30, %v2295_v35 }
 0x571   :  { %1697 = vrot.lane.b32.xlu2 %v1696_v36, %s1784_s19  ;;  %1677 = vrot.lane.b32.xlu1 %v1696_v36, %s1783_s18 }
 0x572   :  { %1662 = vrot.lane.b32.xlu0 %v1696_v36, %s1779_s14 }
 0x579   :  { %1702 = vrot.lane.b32.xlu2 %v1696_v36, %s1781_s16  ;;  %1682 = vrot.lane.b32.xlu1 %v1696_v36, %s1780_s15 }
 0x57a   :  { %1667 = vrot.lane.b32.xlu0 %v1651_v24, %s1784_s19 }
 0x581   :  { %1712 = vrot.lane.b32.xlu2 %v1696_v36, %s1782_s17  ;;  %1687 = vrot.lane.b32.xlu1 %v1651_v24, %s1785_s20 }
 0x582   :  { %1672 = vrot.lane.b32.xlu0 %v1651_v24, %s1781_s16  ;;  %s1789_s16 = smov 75  }
 0x589   :  { %1692 = vrot.lane.b32.xlu1 %v1651_v24, %s1782_s17 }
 0x58a   :  { %1707 = vrot.lane.b32.xlu0 %v1696_v36, %s1785_s20 }
 0x591   :  { %1722 = vrot.lane.b32.xlu1 %v1696_v36, %s1778_s13 }
 0x592   :  { %1717 = vrot.lane.b32.xlu0 %v1651_v24, %s1778_s13 }
 0x5cb   :  { %v1698_v47 = vpop.permute.xlu2 %1697 }
 0x5cc   :  { %v1699_v41 = vunpack.i.l.bf16 %v1698_v47  ;;  %v1700_v55 = vunpack.i.h.bf16 %v1698_v47 }
 0x5d3   :  { %v1703_v56 = vpop.permute.xlu2 %1702 }
 0x5d4   :  { %v1704_v6 = vunpack.i.l.bf16 %v1703_v56  ;;  %v1705_v13 = vunpack.i.h.bf16 %v1703_v56 }
 0x5db   :  { %v1713_v19 = vpop.permute.xlu2 %1712 }
 0x5dc   :  { %v1714_v24 = vunpack.i.l.bf16 %v1713_v19  ;;  %v1715_v26 = vunpack.i.h.bf16 %v1713_v19 }
 0x5e3   :  { %v1678_v10 = vpop.permute.xlu1 %1677 }
 0x5e4   :  { %v1679_v40 = vunpack.i.l.bf16 %v1678_v10  ;;  %v1663_v63 = vpop.permute.xlu0 %1662  ;;  %v1680_v44 = vunpack.i.h.bf16 %v1678_v10 }
 0x5e5   :  { %v1664_v43 = vunpack.i.l.bf16 %v1663_v63  ;;  %v1665_v46 = vunpack.i.h.bf16 %v1663_v63 }
 0x5e6   :  { %1006 = vmatpush.msrb.mxu0 %v1679_v40 }
 0x5e7   :  { %1026 = vmatpush.msra.mxu3 %v1664_v43 }
 0x5e8   :  { %1007 = vmatpush.msrb.mxu0 %v1680_v44 }
 0x5e9   :  { %1027 = vmatpush.msra.mxu3 %v1665_v46 }
 0x5eb   :  { %1028 = vmatpush.msra.mxu3 %v1659_v45  ;;  %v1683_v51 = vpop.permute.xlu1 %1682 }
 0x5ec   :  { %v1684_v14 = vunpack.i.l.bf16 %v1683_v51  ;;  %v1668_v53 = vpop.permute.xlu0 %1667  ;;  %v1685_v54 = vunpack.i.h.bf16 %v1683_v51 }
 0x5ed   :  { %v1669_v42 = vunpack.i.l.bf16 %v1668_v53  ;;  %1029 = vmatpush.msra.mxu3 %v1660_v50  ;;  %v1670_v2 = vunpack.i.h.bf16 %v1668_v53 }
 0x5ef   :  { %1008 = vmatpush.msrb.mxu0 %v1669_v42  ;;  %1030 = vmatpush.msra.mxu3 %v1684_v14 }
 0x5f1   :  { %1009 = vmatpush.msrb.mxu0 %v1670_v2  ;;  %1031 = vmatpush.msra.mxu3 %v1685_v54 }
 0x5f3   :  { %1010 = vmatpush.msrb.mxu0 %v1699_v41  ;;  %v1688_v49 = vpop.permute.xlu1 %1687 }
 0x5f4   :  { %v1689_v57 = vunpack.i.l.bf16 %v1688_v49  ;;  %v1673_v9 = vpop.permute.xlu0 %1672  ;;  %v1690_v59 = vunpack.i.h.bf16 %v1688_v49 }
 0x5f5   :  { %v1674_v58 = vunpack.i.l.bf16 %v1673_v9  ;;  %1011 = vmatpush.msrb.mxu0 %v1700_v55  ;;  %v1675_v61 = vunpack.i.h.bf16 %v1673_v9 }
 0x5f7   :  { %1032 = vmatpush.msra.mxu3 %v1674_v58  ;;  %1012 = vmatpush.msrb.mxu0 %v1689_v57 }
 0x5f9   :  { %1033 = vmatpush.msra.mxu3 %v1675_v61  ;;  %1013 = vmatpush.msrb.mxu0 %v1690_v59 }
 0x5fb   :  { %1034 = vmatpush.msra.mxu3 %v1704_v6  ;;  %v1693_v0 = vpop.permute.xlu1 %1692 }
 0x5fc   :  { %v1694_v1 = vunpack.i.l.bf16 %v1693_v0  ;;  %v1708_v16 = vpop.permute.xlu0 %1707  ;;  %v1695_v20 = vunpack.i.h.bf16 %v1693_v0 }
 0x5fd   :  { %v1709_v18 = vunpack.i.l.bf16 %v1708_v16  ;;  %1035 = vmatpush.msra.mxu3 %v1705_v13  ;;  %v1710_v21 = vunpack.i.h.bf16 %v1708_v16  ;;  %v1283_v16 = vld [vmem:[%s2509_s10] sm:$0xff] }
 0x5ff   :  { %1014 = vmatpush.msrb.mxu0 %v1709_v18  ;;  %1036 = vmatpush.msra.mxu3 %v1694_v1 }
 0x601   :  { %1015 = vmatpush.msrb.mxu0 %v1710_v21  ;;  %1037 = vmatpush.msra.mxu3 %v1695_v20 }
 0x603   :  { %1016 = vmatpush.msrb.mxu0 %v2284_v23  ;;  %1038 = vmatpush.msra.mxu3 %v1714_v24  ;;  %v1723_v29 = vpop.permute.xlu1 %1722 }
 0x604   :  { %v1718_v27 = vpop.permute.xlu0 %1717  ;;  %v1724_v31 = vunpack.i.l.bf16 %v1723_v29  ;;  %v1725_v23 = vunpack.i.h.bf16 %v1723_v29 }
 0x605   :  { %v1719_v28 = vunpack.i.l.bf16 %v1718_v27  ;;  %1017 = vmatpush.msrb.mxu0 %v2279_v22  ;;  %1039 = vmatpush.msra.mxu3 %v1715_v26  ;;  %v1720_v36 = vunpack.i.h.bf16 %v1718_v27 }
 0x606   :  { %1040 = vmatmul.f32.vlgmr.msra.gmra.mxu3 %v2120_v3 }
 0x607   :  { %1018 = vmatpush.msrb.mxu0 %v2295_v35  ;;  %1056 = vmatpush.msrb.mxu1 %v1719_v28 }
 0x609   :  { %1019 = vmatpush.msrb.mxu0 %v2293_v30  ;;  %1057 = vmatpush.msrb.mxu1 %v1720_v36 }
 0x60a   :  { %1020 = vmatmul.f32.vlgmr.msrb.gmra.mxu0 %v2106_v52 }
 0x60b   :  { %1058 = vmatpush.msrb.mxu1 %v1724_v31 }
 0x60d   :  { %1059 = vmatpush.msrb.mxu1 %v1725_v23 }
 0x60e   :  { %1369 = vmatmul.msk.f32.vlgmr.msrb.gmra.mxu1 %vm446_vm15, %v2113_v48 }
 0x60f   :  { %1370 = vmatpush.msk.msra.mxu1 %vm520_vm14, %v2142_v17  ;;  %vm672_vm14 = vcmask 582008  }
 0x611   :  { %1082 = vmatpush.msra.mxu1 %v2147_v4 }
 0x613   :  { %1083 = vmatpush.msra.mxu1 %v2156_v5 }
 0x615   :  { %1084 = vmatpush.msra.mxu1 %v2162_v7 }
 0x617   :  { %1085 = vmatpush.msra.mxu1 %v2170_v12  ;;  %v1372_v12 = vld [vmem:[%s2501_s2 + $0x8] sm:$0xff]  ;;  %s1787_s2 = smov 25  }
 0x619   :  { %1086 = vmatpush.msra.mxu1 %v2177_v15 }
 0x61b   :  { %1087 = vmatpush.msra.mxu1 %v2185_v33 }
 0x61d   :  { %1088 = vmatpush.msra.mxu1 %v2204_v37 }
 0x687   :  { %v1021_v52 = vpop.f32.mrf.mxu0 }
 0x688   :  { %v1022_v48 = vadd.f32 %v1021_v52, %v2164_v8  ;;  %v76_v8 = vld [vmem:[%s2505_s6 + $0x18] sm:$0xff]  ;;  %s1788_s6 = smov 22  }
 0x689   :  { %v1041_v3 = vpop.f32.mrf.mxu3 }
 0x68a   :  { %v1042_v22 = vadd.f32 %v1041_v3, %v1022_v48 }
 0x68b   :  { %v1061_v17 = vpop.f32.mrf.mxu1 }
 0x68c   :  { %v1062_v30 = vadd.f32 %v1061_v17, %v1042_v22  ;;  %v1221_v22 = vld [vmem:[%s2508_s9 + $0x78] sm:$0xff]  ;;  %v1220_v17 = vld [vmem:[%s2508_s9 + $0x70] sm:$0xff] }
 0x68d   :  { %1242 = vmatpush.msrb.mxu2 %v1221_v22 }
 0x68e   :  { %v1064_v4 = vmax.f32 %v1062_v30, 0.0  ;;  %v1219_v30 = vld [vmem:[%s2508_s9 + $0x68] sm:$0xff] }
 0x68f   :  { %1243 = vmatpush.msrb.mxu2 %v1220_v17 }
 0x690   :  { %1066 = vrot.lane.b32.xlu2 %v1064_v4, %s1785_s20 }
 0x691   :  { %1244 = vmatpush.msrb.mxu2 %v1219_v30 }
 0x6ea   :  { %v1067_v5 = vpop.permute.xlu2 %1066 }
 0x6eb   :  { %v1069_v7 = vmax.f32 %v1064_v4, %v1067_v5  ;;  %v1218_v4 = vld [vmem:[%s2508_s9 + $0x60] sm:$0xff]  ;;  %v1217_v5 = vld [vmem:[%s2508_s9 + $0x58] sm:$0xff] }
 0x6ec   :  { %1245 = vmatpush.msrb.mxu2 %v1218_v4 }
 0x6ed   :  { %1371 = vmatmul.msk.f32.vlgmr.msra.gmra.mxu1 %vm516_vm0, %v1069_v7  ;;  %v1216_v7 = vld [vmem:[%s2508_s9 + $0x50] sm:$0xff]  ;;  %vm1239_vm0 = vcmask 588800  }
 0x6ee   :  { %1246 = vmatpush.msrb.mxu2 %v1217_v5 }
 0x6f0   :  { %1247 = vmatpush.msrb.mxu2 %v1216_v7 }
 0x76a   :  { %v1090_v15 = vpop.f32.mrf.mxu1 }
 0x76b   :  { %v1736_v33 = vpack.i.bf16 %v1090_v15, %v1372_v12 }
 0x76d   :  { %1737 = vrot.lane.b32.xlu2 %v1736_v33, %s1784_s19  ;;  %1732 = vrot.lane.b32.xlu1 %v1736_v33, %s1783_s18  ;;  %s1791_s19 = smov 100  }
 0x76e   :  { %1727 = vrot.lane.b32.xlu0 %v1736_v33, %s1782_s17  ;;  %s1790_s17 = smov 50  }
 0x775   :  { %573 = vperm.xlu1 %1555, %v76_v8   ;;  %v1213_v8 = vld [vmem:[%s2508_s9 + $0x38] sm:$0xff] }
 0x776   :  { %1742 = vrot.lane.b32.xlu0 %v1736_v33, %s1785_s20  ;;  %v1230_v33 = vld [vmem:[%s2508_s9 + $0xc0] sm:$0xff] }
 0x777   :  { %1269 = vmatpush.msra.mxu0 %v1230_v33 }
 0x7c7   :  { %v1738_v39 = vpop.permute.xlu2 %1737 }
 0x7c8   :  { %v1739_v40 = vunpack.i.l.bf16 %v1738_v39  ;;  %v1740_v44 = vunpack.i.h.bf16 %v1738_v39  ;;  %v1210_v39 = vld [vmem:[%s2508_s9 + $0x20] sm:$0xff] }
 0x7df   :  { %v1733_v37 = vpop.permute.xlu1 %1732 }
 0x7e0   :  { %v1728_v35 = vpop.permute.xlu0 %1727  ;;  %v1734_v38 = vunpack.i.l.bf16 %v1733_v37  ;;  %v1735_v11 = vunpack.i.h.bf16 %v1733_v37  ;;  %v1229_v37 = vld [vmem:[%s2508_s9 + $0xb8] sm:$0xff] }
 0x7e1   :  { %v1729_v32 = vunpack.i.l.bf16 %v1728_v35  ;;  %v1730_v34 = vunpack.i.h.bf16 %v1728_v35  ;;  %1270 = vmatpush.msra.mxu0 %v1229_v37  ;;  %v1212_v35 = vld [vmem:[%s2508_s9 + $0x30] sm:$0xff] }
 0x7e3   :  { %1127 = vmatpush.msrb.mxu1 %v1729_v32  ;;  %v1228_v32 = vld [vmem:[%s2508_s9 + $0xb0] sm:$0xff] }
 0x7e4   :  { %1271 = vmatpush.msra.mxu0 %v1228_v32 }
 0x7e5   :  { %1128 = vmatpush.msrb.mxu1 %v1730_v34  ;;  %v1211_v34 = vld [vmem:[%s2508_s9 + $0x28] sm:$0xff] }
 0x7e7   :  { %1129 = vmatpush.msrb.mxu1 %v1734_v38  ;;  %v574_v62 = vpop.permute.xlu1 %573  ;;  %v1227_v38 = vld [vmem:[%s2508_s9 + $0xa8] sm:$0xff] }
 0x7e8   :  { %v598_v10 = vadd.f32 %v2291_v25, %v574_v62  ;;  %v1743_v43 = vpop.permute.xlu0 %1742  ;;  %1272 = vmatpush.msra.mxu0 %v1227_v38 }
 0x7e9   :  { %1130 = vmatpush.msrb.mxu1 %v1735_v11  ;;  %v1744_v45 = vunpack.i.l.bf16 %v1743_v43  ;;  %v1745_v46 = vunpack.i.h.bf16 %v1743_v43  ;;  %v1226_v11 = vld [vmem:[%s2508_s9 + $0xa0] sm:$0xff]  ;;  %v1207_v43 = vld [vmem:[%s2508_s9 + $0x8] sm:$0xff] }
 0x7ea   :  { %v600_v63 = vmax.f32 %v598_v10, 0.0  ;;  %1273 = vmatpush.msra.mxu0 %v1226_v11  ;;  %v1225_v10 = vld [vmem:[%s2508_s9 + $0x98] sm:$0xff] }
 0x7eb   :  { %1131 = vmatpush.msrb.mxu1 %v1739_v40  ;;  %v1208_v40 = vld [vmem:[%s2508_s9 + $0x10] sm:$0xff] }
 0x7ec   :  { %602 = vrot.lane.b32.xlu2 %v600_v63, %s1785_s20  ;;  %1274 = vmatpush.msra.mxu0 %v1225_v10 }
 0x7ed   :  { %1132 = vmatpush.msrb.mxu1 %v1740_v44  ;;  %v1223_v44 = vld [vmem:[%s2508_s9 + $0x88] sm:$0xff] }
 0x7ef   :  { %1133 = vmatpush.msrb.mxu1 %v1744_v45 }
 0x7f1   :  { %1134 = vmatpush.msrb.mxu1 %v1745_v46  ;;  %v1206_v46 = vld [vmem:[%s2508_s9] sm:$0xff] }
 0x7f3   :  { %1135 = vmatpush.msrb.mxu1 %v1372_v12  ;;  %v1215_v12 = vld [vmem:[%s2508_s9 + $0x48] sm:$0xff] }
 0x7f4   :  { %1248 = vmatpush.msrb.mxu2 %v1215_v12 }
 0x7f5   :  { %1136 = vmatpush.msrb.mxu1 %v1090_v15  ;;  %v1214_v15 = vld [vmem:[%s2508_s9 + $0x40] sm:$0xff] }
 0x7f6   :  { %1373 = vmatmul.msk.f32.vlgmr.msrb.gmra.mxu1 %vm576_vm1, %v2252_v60  ;;  %1249 = vmatpush.msrb.mxu2 %v1214_v15 }
 0x7f8   :  { %1250 = vmatpush.msrb.mxu2 %v1213_v8 }
 0x7fa   :  { %1251 = vmatpush.msrb.mxu2 %v1212_v35 }
 0x7fc   :  { %1252 = vmatpush.msrb.mxu2 %v1211_v34 }
 0x7fe   :  { %1253 = vmatpush.msrb.mxu2 %v1210_v39 }
 0x846   :  { %v603_v47 = vpop.permute.xlu2 %602 }
 0x847   :  { %v605_v25 = vmax.f32 %v600_v63, %v603_v47  ;;  %v1224_v63 = vld [vmem:[%s2508_s9 + $0x90] sm:$0xff]  ;;  %v1222_v47 = vld [vmem:[%s2508_s9 + $0x80] sm:$0xff] }
 0x848   :  { %1275 = vmatpush.msra.mxu0 %v1224_v63 }
 0x849   :  { %616 = vst.sshfl [vmem:[#allocation1] sm:$0xff pattern:$0x73625140] %v605_v25  ;;  %v1354_v50 = vrot.slane %v605_v25, 9 }
 0x84a   :  { %607 = vst.msk [vmem:[#allocation2] sm:$0x1] %vm606_vm4, %v605_v25  ;;  %1276 = vmatpush.msra.mxu0 %v1223_v44 }
 0x84b   :  { %611 = vrot.lane.b32.xlu1 %v1354_v50, %s1787_s2  ;;  %v1293_v50 = vld [vmem:[%s2509_s10 + $0x50] sm:$0xff] }
 0x84c   :  { %1277 = vmatpush.msra.mxu0 %v1222_v47 }
 0x850   :  { %v618_v51 = vld [vmem:[#allocation1 + $0x1] ss:$4 sm:$0xff] }
 0x851   :  { %624 = vst.sshfl [vmem:[#allocation1] sm:$0xff pattern:$0x73625140] %v605_v25 }
 0x858   :  { %v626_v14 = vld [vmem:[#allocation1 + $0x1] ss:$4 sm:$0xff] }
 0x859   :  { %634 = vst.sshfl [vmem:[#allocation1] sm:$0xff pattern:$0x73625140] %v605_v25  ;;  %v1355_v2 = vrot.slane %v626_v14, 9 }
 0x860   :  { %v636_v53 = vld [vmem:[#allocation1 + $0x2] ss:$4 sm:$0xff] }
 0x861   :  { %642 = vst.sshfl [vmem:[#allocation1] sm:$0xff pattern:$0x73625140] %v605_v25 }
 0x868   :  { %v644_v42 = vld [vmem:[#allocation1 + $0x2] ss:$4 sm:$0xff] }
 0x869   :  { %v1356_v54 = vrot.slane %v644_v42, 9  ;;  %656 = vst.sshfl [vmem:[#allocation1] sm:$0xff pattern:$0x73625140] %v605_v25 }
 0x86b   :  { %647 = vrot.lane.b32.xlu1 %v1356_v54, %s1783_s18  ;;  %v1290_v54 = vld [vmem:[%s2509_s10 + $0x38] sm:$0xff] }
 0x870   :  { %v658_v60 = vld [vmem:[#allocation1 + $0x3] ss:$4 sm:$0xff] }
 0x871   :  { %659 = vrot.lane.b32.xlu2 %v658_v60, %s1788_s6  ;;  %664 = vst.sshfl [vmem:[#allocation1] sm:$0xff pattern:$0x73625140] %v605_v25  ;;  %v1294_v25 = vld [vmem:[%s2509_s10 + $0x58] sm:$0xff] }
 0x872   :  { %1310 = vmatpush.msrb.mxu3 %v1294_v25 }
 0x873   :  { %v1138_v41 = vpop.f32.mrf.mxu1  ;;  %629 = vrot.lane.b32.xlu1 %v1355_v2, %s1789_s16 }
 0x874   :  { %v1139_v55 = vadd.f32 %v1138_v41, %v574_v62  ;;  %v1209_v62 = vld [vmem:[%s2508_s9 + $0x18] sm:$0xff]  ;;  %1311 = vmatpush.msrb.mxu3 %v1293_v50 }
 0x875   :  { %1254 = vmatpush.msrb.mxu2 %v1209_v62 }
 0x876   :  { %v1141_v49 = vmax.f32 %v1139_v55, 0.0 }
 0x877   :  { %1255 = vmatpush.msrb.mxu2 %v1208_v40 }
 0x878   :  { %1143 = vrot.lane.b32.xlu0 %v1141_v49, %s1785_s20  ;;  %v666_v59 = vld [vmem:[#allocation1 + $0x3] ss:$4 sm:$0xff]  ;;  %s1792_s20 = smov 47  }
 0x879   :  { %v1357_v27 = vrot.slane %v666_v59, 9  ;;  %1256 = vmatpush.msrb.mxu2 %v1207_v43  ;;  %v77_v59 = vld [vmem:[%s2510_s11] sm:$0x3] }
 0x87b   :  { %1257 = vmatpush.msrb.mxu2 %v1206_v46 }
 0x880   :  { %619 = vrot.lane.b32.xlu0 %v618_v51, %s1790_s17  ;;  %v1292_v51 = vld [vmem:[%s2509_s10 + $0x48] sm:$0xff] }
 0x881   :  { %1312 = vmatpush.msrb.mxu3 %v1292_v51 }
 0x888   :  { %637 = vrot.lane.b32.xlu0 %v636_v53, %s1791_s19  ;;  %v1291_v53 = vld [vmem:[%s2509_s10 + $0x40] sm:$0xff] }
 0x889   :  { %1313 = vmatpush.msrb.mxu3 %v1291_v53 }
 0x88b   :  { %1314 = vmatpush.msrb.mxu3 %v1290_v54 }
 0x8bd   :  { %v612_v56 = vpop.permute.xlu1 %611 }
 0x8be   :  { %615 = vst.msk [vmem:[#allocation2] sm:$0x1] %vm614_vm5, %v612_v56 }
 0x8cb   :  { %v660_v21 = vpop.permute.xlu2 %659 }
 0x8dd   :  { %v648_v57 = vpop.permute.xlu1 %647 }
 0x8de   :  { %v649_v1 = vrot.slane %v648_v57, 6 }
 0x8e0   :  { %v650_v19 = vsel %vm102_vm11, %v649_v1, %v648_v57  ;;  %v1284_v1 = vld [vmem:[%s2509_s10 + $0x8] sm:$0xff] }
 0x8e5   :  { %v630_v13 = vpop.permute.xlu1 %629 }
 0x8ea   :  { %v1144_v9 = vpop.permute.xlu0 %1143 }
 0x8eb   :  { %v1146_v58 = vmax.f32 %v1141_v49, %v1144_v9  ;;  %v1289_v9 = vld [vmem:[%s2509_s10 + $0x30] sm:$0xff] }
 0x8ec   :  { %1315 = vmatpush.msrb.mxu3 %v1289_v9 }
 0x8ed   :  { %1155 = vst.sshfl [vmem:[#allocation1] sm:$0xff pattern:$0x73625140] %v1146_v58  ;;  %v1374_v61 = vrot.slane %v1146_v58, 9 }
 0x8ee   :  { %1147 = vst.msk [vmem:[#allocation2 + $0x1] sm:$0x1] %vm606_vm4, %v1146_v58 }
 0x8ef   :  { %1151 = vrot.lane.b32.xlu2 %v1374_v61, %s1787_s2  ;;  %v1287_v61 = vld [vmem:[%s2509_s10 + $0x20] sm:$0xff]  ;;  %s1794_s2 = smov [#allocation3]  }
 0x8f2   :  { %v620_v6 = vpop.permute.xlu0 %619 }
 0x8f3   :  { %623 = vst.msk [vmem:[#allocation2] sm:$0x1] %vm622_vm6, %v620_v6  ;;  %v1232_v6 = vperm.slane %v77_v59, 0 }
 0x8f4   :  { %v1157_v0 = vld [vmem:[#allocation1 + $0x1] ss:$4 sm:$0xff]  ;;  %633 = vst.msk [vmem:[#allocation2] sm:$0x1] %vm632_vm7, %v630_v13 }
 0x8f5   :  { %1162 = vst.sshfl [vmem:[#allocation1] sm:$0xff pattern:$0x73625140] %v1146_v58  ;;  %v1286_v13 = vld [vmem:[%s2509_s10 + $0x18] sm:$0xff] }
 0x8f7   :  { %1158 = vrot.lane.b32.xlu2 %v1157_v0, %s1790_s17  ;;  %v1285_v0 = vld [vmem:[%s2509_s10 + $0x10] sm:$0xff] }
 0x8fa   :  { %v638_v18 = vpop.permute.xlu0 %637 }
 0x8fb   :  { %641 = vst.msk [vmem:[#allocation2] sm:$0x1] %vm640_vm10, %v638_v18  ;;  %v1295_v18 = vperm.slane %v77_v59, 1 }
 0x8fc   :  { %655 = vst.msk [vmem:[#allocation2] sm:$0x5] %vm2358_vm12, %v650_v19  ;;  %v1164_v20 = vld [vmem:[#allocation1 + $0x1] ss:$4 sm:$0xff] }
 0x8fd   :  { %v1375_v24 = vrot.slane %v1164_v20, 9  ;;  %1171 = vst.sshfl [vmem:[#allocation1] sm:$0xff pattern:$0x73625140] %v1146_v58 }
 0x8fe   :  { %663 = vst.msk [vmem:[#allocation2 + $0x2] sm:$0x1] %vm662_vm13, %v660_v21 }
 0x8ff   :  { %1167 = vrot.lane.b32.xlu2 %v1375_v24, %s1789_s16 }
 0x904   :  { %v1173_v26 = vld [vmem:[#allocation1 + $0x2] ss:$4 sm:$0xff] }
 0x905   :  { %1174 = vrot.lane.b32.xlu1 %v1173_v26, %s1791_s19  ;;  %1178 = vst.sshfl [vmem:[#allocation1] sm:$0xff pattern:$0x73625140] %v1146_v58 }
 0x90c   :  { %v1180_v28 = vld [vmem:[#allocation1 + $0x2] ss:$4 sm:$0xff] }
 0x90d   :  { %669 = vrot.lane.b32.xlu1 %v1357_v27, %s1792_s20  ;;  %v1376_v29 = vrot.slane %v1180_v28, 9  ;;  %1189 = vst.sshfl [vmem:[#allocation1] sm:$0xff pattern:$0x73625140] %v1146_v58 }
 0x90f   :  { %1183 = vrot.lane.b32.xlu0 %v1376_v29, %s1783_s18 }
 0x914   :  { %v1191_v36 = vld [vmem:[#allocation1 + $0x3] ss:$4 sm:$0xff] }
 0x915   :  { %1196 = vst.sshfl [vmem:[#allocation1] sm:$0xff pattern:$0x73625140] %v1146_v58  ;;  %v1288_v58 = vld [vmem:[%s2509_s10 + $0x28] sm:$0xff]  ;;  %1298 = vrot.lane.b32.xlu1 %v1295_v18, %s1793_s5  ;;  %s1334_s10 = sshll.u32 %s2511_s12, 4  ;;  %s1335_s10 = int_to_ptr.hbm [resolvable:$true] %s1334_s10 }
 0x916   :  { %1316 = vmatpush.msrb.mxu3 %v1288_v58 }
 0x917   :  { %1192 = vrot.lane.b32.xlu0 %v1191_v36, %s1788_s6  ;;  %s1332_s6 = sshll.u32 %s1794_s2, 4  ;;  %s1333_s6 = int_to_ptr.vmem [resolvable:$true] %s1332_s6 }
 0x918   :  { %1317 = vmatpush.msrb.mxu3 %v1287_v61 }
 0x91a   :  { %1318 = vmatpush.msrb.mxu3 %v1286_v13 }
 0x91c   :  { %v1198_v31 = vld [vmem:[#allocation1 + $0x3] ss:$4 sm:$0xff]  ;;  %1319 = vmatpush.msrb.mxu3 %v1285_v0 }
 0x91d   :  { %v1377_v23 = vrot.slane %v1198_v31, 9 }
 0x91e   :  { %1320 = vmatpush.msrb.mxu3 %v1284_v1 }
 0x91f   :  { %1201 = vrot.lane.b32.xlu2 %v1377_v23, %s1792_s20  ;;  %1296 = vrot.lane.b32.xlu0 %v1232_v6, %s1793_s5 }
 0x920   :  { %1321 = vmatpush.msrb.mxu3 %v1283_v16 }
 0x949   :  { %v1152_v52 = vpop.permute.xlu2 %1151 }
 0x94a   :  { %1154 = vst.msk [vmem:[#allocation2 + $0x1] sm:$0x1] %vm614_vm5, %v1152_v52 }
 0x951   :  { %v1159_v48 = vpop.permute.xlu2 %1158 }
 0x952   :  { %1161 = vst.msk [vmem:[#allocation2 + $0x1] sm:$0x1] %vm622_vm6, %v1159_v48 }
 0x959   :  { %v1168_v3 = vpop.permute.xlu2 %1167 }
 0x95a   :  { %1170 = vst.msk [vmem:[#allocation2 + $0x1] sm:$0x1] %vm632_vm7, %v1168_v3 }
 0x977   :  { %v1175_v45 = vpop.permute.xlu1 %1174 }
 0x978   :  { %1177 = vst.msk [vmem:[#allocation2 + $0x1] sm:$0x1] %vm640_vm10, %v1175_v45 }
 0x979   :  { %v1202_v55 = vpop.permute.xlu2 %1201 }
 0x97f   :  { %v670_v14 = vpop.permute.xlu1 %669 }
 0x980   :  { %673 = vst.msk [vmem:[#allocation2 + $0x2] sm:$0x1] %vm672_vm14, %v670_v14 }
 0x981   :  { %v1184_v42 = vpop.permute.xlu0 %1183 }
 0x982   :  { %v1185_v60 = vrot.slane %v1184_v42, 6 }
 0x984   :  { %v1186_v2 = vsel %vm102_vm11, %v1185_v60, %v1184_v42  ;;  %vm1302_vm11 = vcmask 785408  }
 0x985   :  { %1188 = vst.msk [vmem:[#allocation2 + $0x1] sm:$0x5] %vm2358_vm12, %v1186_v2 }
 0x987   :  { %v1299_v27 = vpop.permute.xlu1 %1298 }
 0x989   :  { %v1193_v41 = vpop.permute.xlu0 %1192 }
 0x98a   :  { %1195 = vst.msk [vmem:[#allocation2 + $0x3] sm:$0x1] %vm662_vm13, %v1193_v41 }
 0x98b   :  { %1204 = vst.msk [vmem:[#allocation2 + $0x3] sm:$0x1] %vm672_vm14, %v1202_v55 }
 0x991   :  { %v1297_v28 = vpop.permute.xlu0 %1296 }
 0x992   :  { %v1205_v49 = vld [vmem:[#allocation2] sm:$0xf]  ;;  %v1300_v29 = vsel %vm446_vm15, %v1297_v28, %v1299_v27 }
 0x993   :  { %1235 = vst [vmem:[#allocation1] ss:$4 sm:$0xff] %v1205_v49 }
 0x99a   :  { %v1236_v56 = vld.sshfl [vmem:[#allocation1] sm:$0xff pattern:$0x73625140]  ;;  %v1237_v57 = vld.sshfl [vmem:[#allocation1 + $0x8] sm:$0xff pattern:$0x73625140] }
 0x99b   :  { %1258 = vmatmul.f32.vlgmr.msrb.gmra.mxu2 %v1236_v56  ;;  %1378 = vmatmul.msk.f32.vlgmr.msra.gmra.mxu0 %vm1239_vm0, %v1237_v57 }
 0xa18   :  { %v1279_v21 = vpop.f32.mrf.mxu0 }
 0xa1e   :  { %v1259_v19 = vpop.f32.mrf.mxu2 }
 0xa1f   :  { %v1260_v20 = vadd.f32 %v1259_v19, %v1232_v6 }
 0xa21   :  { %v1280_v24 = vadd.f32 %v1279_v21, %v1260_v20 }
 0xa23   :  { %v1282_v26 = vmax.f32 %v1280_v24, 0.0 }
 0xa25   :  { %1379 = vmatmul.msk.f32.vlgmr.msrb.gmra.mxu3 %vm1302_vm11, %v1282_v26 }
 0xaa8   :  { %v1323_v36 = vpop.f32.mrf.mxu3 }
 0xaa9   :  { %v1324_v31 = vadd.f32 %v1323_v36, %v1300_v29 }
 0xaab   :  { %1326 = vst [vmem:[#allocation3] sm:$0x3] %v1324_v31 }
 0xaac   :  { %1337 = dma.vmem_to_hbm [thread:$0]  %s1333_s6, 32, %s1335_s10, [#allocation4]  }
 0xaad   :  { %1770 = dma.done.wait [#allocation4], 32  }
 0xaae   :  { %1771 = vsyncadd [#allocation4], 4294967264 }
 0xaaf   :  { %1342 = vsyncpa [#allocation4], 1 }

</bundles_post_ra>
